<compile_context>
chip_gen: v6e
topology: v6e:2x2x1
jax: 0.10.0
libtpu: 0.0.40
codegen_flags: <defaults>
</compile_context>

<pallas_src>
import math
import functools

import jax
import jax.numpy as jnp
from jax.experimental import pallas as pl
from jax.experimental.pallas import tpu as pltpu


def _round_up(x, m):
    return ((x + m - 1) // m) * m


# ----------------------------- Pallas kernels ------------------------------ #

def _linear_kernel(x_ref, w_ref, b_ref, o_ref, acc_ref, *, activation):
    """Tiled matmul; grid = (M-tiles, N-tiles, K-tiles), K (reduction) last."""
    @pl.when(pl.program_id(2) == 0)
    def _():
        acc_ref[...] = jnp.zeros_like(acc_ref)

    acc_ref[...] += jnp.dot(x_ref[...], w_ref[...],
                            preferred_element_type=jnp.float32)

    @pl.when(pl.program_id(2) == pl.num_programs(2) - 1)
    def _():
        y = acc_ref[...] + b_ref[...]
        if activation == "relu":
            y = jnp.maximum(y, 0.0)
        o_ref[...] = y.astype(o_ref.dtype)


def _add_ln_kernel(x_ref, y_ref, g_ref, b_ref, o_ref, *, eps):
    """Fused residual add + LayerNorm over the last dim (f32 VPU math)."""
    x = x_ref[...].astype(jnp.float32) + y_ref[...].astype(jnp.float32)
    mean = jnp.mean(x, axis=-1, keepdims=True)
    xc = x - mean
    var = jnp.mean(xc * xc, axis=-1, keepdims=True)
    inv = jax.lax.rsqrt(var + eps)
    o_ref[...] = (xc * inv * g_ref[...] + b_ref[...]).astype(o_ref.dtype)


def _attn_body(q, k, v, o_ref, *, num_heads, causal, scale):
    """softmax(q k^T * scale [+ causal mask]) v for all heads of one batch row."""
    sq, d = q.shape
    sk = k.shape[0]
    dh = d // num_heads

    if causal:
        # Additive causal mask generated in-kernel, hoisted out of the head loop.
        row = jax.lax.broadcasted_iota(jnp.int32, (sq, sk), 0)
        col = jax.lax.broadcasted_iota(jnp.int32, (sq, sk), 1)
        neg = jnp.where(col > row, -1e30, 0.0).astype(jnp.float32)

    outs = []
    for h in range(num_heads):            # static unrolled loop over heads
        lo, hi = h * dh, (h + 1) * dh
        qh, kh, vh = q[:, lo:hi], k[:, lo:hi], v[:, lo:hi]
        # Contract last dims of Q and K directly (no materialized transpose).
        s = jax.lax.dot_general(qh, kh, (((1,), (1,)), ((), ())),
                                preferred_element_type=jnp.float32) * scale
        if causal:
            s = s + neg
        m = jnp.max(s, axis=-1, keepdims=True)
        p = jnp.exp(s - m)
        denom = jnp.sum(p, axis=-1, keepdims=True)
        p = p * pl.reciprocal(denom, approx=True)          # EUP reciprocal
        outs.append(jnp.dot(p.astype(jnp.bfloat16), vh,
                            preferred_element_type=jnp.float32))
    # Single lane-dense store of the concatenated heads.
    o_ref[0] = jnp.concatenate(outs, axis=-1).astype(o_ref.dtype)


def _self_attn_kernel(qkv_ref, o_ref, *, num_heads, causal, scale, d_model):
    qkv = qkv_ref[0]                                       # (S, 3D) bf16
    d = d_model
    _attn_body(qkv[:, :d], qkv[:, d:2 * d], qkv[:, 2 * d:], o_ref,
               num_heads=num_heads, causal=causal, scale=scale)


def _cross_attn_kernel(q_ref, kv_ref, o_ref, *, num_heads, causal, scale, d_model):
    kv = kv_ref[0]                                         # (Sk, 2D) bf16
    d = d_model
    _attn_body(q_ref[0], kv[:, :d], kv[:, d:], o_ref,
               num_heads=num_heads, causal=causal, scale=scale)


# ----------------------------- Pallas wrappers ----------------------------- #

_MATMUL_PARAMS = pltpu.CompilerParams(
    dimension_semantics=("parallel", "parallel", "arbitrary"),
    vmem_limit_bytes=32 * 1024 * 1024)   # v7x-safe (64 MiB physical VMEM)


def linear(x2d, w, b, activation=None, out_dtype=jnp.float32):
    """y = x2d @ w + b (optional ReLU).  bf16 operands, f32 accumulation.

    M is padded to x8 and N to x128 so every block is MXU-aligned and every
    output store is lane-dense; K is left un-padded / un-tiled when it fits a
    single block.  The result is sliced back to (M, N).
    """
    M, K = x2d.shape
    N = w.shape[1]

    TM = min(256, _round_up(M, 8))
    TN = min(256, _round_up(N, 128))
    TK = K if K <= 512 else 512
    Mp, Np, Kp = _round_up(M, TM), _round_up(N, TN), _round_up(K, TK)

    xb = x2d.astype(jnp.bfloat16)
    wb = w.astype(jnp.bfloat16)
    bb = b.astype(jnp.float32)
    if (Mp, Kp) != (M, K):
        xb = jnp.pad(xb, ((0, Mp - M), (0, Kp - K)))
    if (Kp, Np) != (K, N):
        wb = jnp.pad(wb, ((0, Kp - K), (0, Np - N)))
    if Np != N:
        bb = jnp.pad(bb, (0, Np - N))
    bb = bb.reshape(1, Np)

    kernel = functools.partial(_linear_kernel, activation=activation)
    out = pl.pallas_call(
        kernel,
        out_shape=jax.ShapeDtypeStruct((Mp, Np), out_dtype),
        grid=(Mp // TM, Np // TN, Kp // TK),
        in_specs=[
            pl.BlockSpec((TM, TK), lambda i, j, k: (i, k)),
            pl.BlockSpec((TK, TN), lambda i, j, k: (k, j)),
            pl.BlockSpec((1, TN), lambda i, j, k: (0, j)),
        ],
        out_specs=pl.BlockSpec((TM, TN), lambda i, j, k: (i, j)),
        scratch_shapes=[pltpu.VMEM((TM, TN), jnp.float32)],
        compiler_params=_MATMUL_PARAMS,
    )(xb, wb, bb)
    if (Mp, Np) != (M, N):
        out = out[:M, :N]
    return out


def add_layer_norm(x2d, y2d, gamma, beta, eps=1e-5):
    """LayerNorm(x + y) over the last dim, row-tiled."""
    M, D = x2d.shape
    TM = min(256, _round_up(M, 8))
    Mp = _round_up(M, TM)
    xb, yb = x2d, y2d
    if Mp != M:
        xb = jnp.pad(xb, ((0, Mp - M), (0, 0)))
        yb = jnp.pad(yb, ((0, Mp - M), (0, 0)))
    kernel = functools.partial(_add_ln_kernel, eps=eps)
    out = pl.pallas_call(
        kernel,
        out_shape=jax.ShapeDtypeStruct((Mp, D), jnp.float32),
        grid=(Mp // TM,),
        in_specs=[
            pl.BlockSpec((TM, D), lambda i: (i, 0)),
            pl.BlockSpec((TM, D), lambda i: (i, 0)),
            pl.BlockSpec((1, D), lambda i: (0, 0)),
            pl.BlockSpec((1, D), lambda i: (0, 0)),
        ],
        out_specs=pl.BlockSpec((TM, D), lambda i: (i, 0)),
        compiler_params=pltpu.CompilerParams(dimension_semantics=("parallel",)),
    )(xb, yb, gamma.reshape(1, D), beta.reshape(1, D))
    return out[:M] if Mp != M else out


def self_attention(qkv, num_heads, causal):
    """Multi-head self-attention; qkv is the fused projection (B, S, 3D) bf16."""
    B, S, D3 = qkv.shape
    D = D3 // 3
    scale = 1.0 / math.sqrt(D // num_heads)
    kernel = functools.partial(_self_attn_kernel, num_heads=num_heads,
                               causal=causal, scale=scale, d_model=D)
    return pl.pallas_call(
        kernel,
        out_shape=jax.ShapeDtypeStruct((B, S, D), jnp.bfloat16),
        grid=(B,),
        in_specs=[pl.BlockSpec((1, S, D3), lambda b: (b, 0, 0))],
        out_specs=pl.BlockSpec((1, S, D), lambda b: (b, 0, 0)),
        compiler_params=pltpu.CompilerParams(dimension_semantics=("parallel",)),
    )(qkv)


def cross_attention(q, kv, num_heads):
    """Unmasked multi-head attention; q (B,Sq,D), kv fused projection (B,Sk,2D)."""
    B, Sq, D = q.shape
    Sk = kv.shape[1]
    scale = 1.0 / math.sqrt(D // num_heads)
    kernel = functools.partial(_cross_attn_kernel, num_heads=num_heads,
                               causal=False, scale=scale, d_model=D)
    return pl.pallas_call(
        kernel,
        out_shape=jax.ShapeDtypeStruct((B, Sq, D), jnp.bfloat16),
        grid=(B,),
        in_specs=[
            pl.BlockSpec((1, Sq, D), lambda b: (b, 0, 0)),
            pl.BlockSpec((1, Sk, 2 * D), lambda b: (b, 0, 0)),
        ],
        out_specs=pl.BlockSpec((1, Sq, D), lambda b: (b, 0, 0)),
        compiler_params=pltpu.CompilerParams(dimension_semantics=("parallel",)),
    )(q, kv)


def self_mha(x, p, num_heads, causal):
    """nn.MultiheadAttention self-attention, eval mode."""
    B, S, D = x.shape
    qkv = linear(x.reshape(B * S, D), p["w_qkv"], p["b_qkv"],
                 out_dtype=jnp.bfloat16).reshape(B, S, 3 * D)
    o = self_attention(qkv, num_heads, causal)
    o = linear(o.reshape(B * S, D), p["wo"], p["bo"])
    return o.reshape(B, S, D)


def cross_mha(x, memory, p, num_heads):
    """nn.MultiheadAttention cross-attention (no mask), eval mode."""
    B, S, D = x.shape
    Sk = memory.shape[1]
    q = linear(x.reshape(B * S, D), p["wq"], p["bq"],
               out_dtype=jnp.bfloat16).reshape(B, S, D)
    kv = linear(memory.reshape(B * Sk, D), p["w_kv"], p["b_kv"],
                out_dtype=jnp.bfloat16).reshape(B, Sk, 2 * D)
    o = cross_attention(q, kv, num_heads)
    o = linear(o.reshape(B * S, D), p["wo"], p["bo"])
    return o.reshape(B, S, D)


# --------------------------- model forward pass ----------------------------- #

def positional_encoding_table(max_len, dim_model):
    position = jnp.arange(max_len, dtype=jnp.float32)[:, None]
    div_term = jnp.exp(jnp.arange(0, dim_model, 2, dtype=jnp.float32)
                       * (-math.log(10000.0) / dim_model))
    angles = position * div_term                       # (max_len, D/2)
    pe = jnp.stack([jnp.sin(angles), jnp.cos(angles)], axis=-1)
    return pe.reshape(max_len, dim_model)              # interleaved sin/cos


def transformer_decoder_only_forward(tokens, params, cfg, causal=True):
    """Matches TransformerDecoderOnly.forward(tgt, memory=None).

    `causal=True` corresponds to fit()-style usage (tgt_mask = upper-triangular
    causal mask); `causal=False` matches forward(tgt) with tgt_mask=None.
    """
    B, S = tokens.shape
    D, H = cfg["embed_dim"], cfg["num_heads"]

    # Embedding * sqrt(d_model) + positional encoding (JAX glue).
    x = params["embedding"][tokens] * math.sqrt(D)                 # (B, S, D)
    x = x + params["pe"][:S][None, :, :]

    memory = x   # forward(memory=None) => memory = tgt after positional encoding

    for lp in params["layers"]:
        # --- self attention block (post-norm, norm_first=False) ---
        sa = self_mha(x, lp["self_attn"], H, causal)
        x = add_layer_norm(x.reshape(B * S, D), sa.reshape(B * S, D),
                           lp["norm1_g"], lp["norm1_b"]).reshape(B, S, D)
        # --- cross attention block (memory = embedded tgt, no mask) ---
        ca = cross_mha(x, memory, lp["cross_attn"], H)
        x = add_layer_norm(x.reshape(B * S, D), ca.reshape(B * S, D),
                           lp["norm2_g"], lp["norm2_b"]).reshape(B, S, D)
        # --- feed-forward block (ReLU activation, PyTorch default) ---
        h = linear(x.reshape(B * S, D), lp["lin1_w"], lp["lin1_b"],
                   activation="relu", out_dtype=jnp.bfloat16)
        h = linear(h, lp["lin2_w"], lp["lin2_b"])
        x = add_layer_norm(x.reshape(B * S, D), h,
                           lp["norm3_g"], lp["norm3_b"]).reshape(B, S, D)

    # Final vocab projection (vocab padded to a lane multiple inside linear()).
    logits = linear(x.reshape(B * S, D), params["fc_w"], params["fc_b"])
    return logits.reshape(B, S, cfg["vocab_size"])


# ------------------------------ param init ---------------------------------- #

def init_params(key, cfg, max_len=64):
    D, H, FF, V, L = (cfg["embed_dim"], cfg["num_heads"],
                      cfg["feedforward_dim"], cfg["vocab_size"], cfg["layers"])

    keys = iter(jax.random.split(key, 16 + 16 * L))

    def w(shape, scale=0.02):
        return (scale * jax.random.normal(next(keys), shape)).astype(jnp.float32)

    layers = []
    for _ in range(L):
        layers.append({
            "self_attn": {
                "w_qkv": w((D, 3 * D)), "b_qkv": jnp.zeros((3 * D,), jnp.float32),
                "wo": w((D, D)), "bo": jnp.zeros((D,), jnp.float32),
            },
            "cross_attn": {
                "wq": w((D, D)), "bq": jnp.zeros((D,), jnp.float32),
                "w_kv": w((D, 2 * D)), "b_kv": jnp.zeros((2 * D,), jnp.float32),
                "wo": w((D, D)), "bo": jnp.zeros((D,), jnp.float32),
            },
            "lin1_w": w((D, FF)), "lin1_b": jnp.zeros((FF,), jnp.float32),
            "lin2_w": w((FF, D)), "lin2_b": jnp.zeros((D,), jnp.float32),
            "norm1_g": jnp.ones((D,), jnp.float32), "norm1_b": jnp.zeros((D,), jnp.float32),
            "norm2_g": jnp.ones((D,), jnp.float32), "norm2_b": jnp.zeros((D,), jnp.float32),
            "norm3_g": jnp.ones((D,), jnp.float32), "norm3_b": jnp.zeros((D,), jnp.float32),
        })

    return {
        "embedding": w((V, D), scale=1.0),
        "pe": positional_encoding_table(max_len, D),
        "layers": layers,
        "fc_w": w((D, V)),
        "fc_b": jnp.zeros((V,), jnp.float32),
    }


# ---------------------------------- main ------------------------------------ #

if __name__ == "__main__":
    cfg = dict(vocab_size=50, embed_dim=32, num_heads=4,
               layers=2, feedforward_dim=64)
    B, S = 2, 8

    key = jax.random.PRNGKey(0)
    k_param, k_tok = jax.random.split(key)
    params = init_params(k_param, cfg)
    tokens = jax.random.randint(k_tok, (B, S), 0, cfg["vocab_size"], dtype=jnp.int32)

    fwd = jax.jit(lambda t, p: transformer_decoder_only_forward(t, p, cfg, causal=True))
    logits = jax.block_until_ready(fwd(tokens, params))

    assert logits.shape == (B, S, cfg["vocab_size"])
    assert bool(jnp.all(jnp.isfinite(logits)))
    print("KERNEL_OK")
</pallas_src>

<mosaic_0001>
module attributes {stable_mosaic.version = 11 : i64} {
  func.func @_linear_kernel(%arg0: i32, %arg1: i32, %arg2: i32, %arg3: memref<16x32xbf16, #tpu.memory_space<vmem>>, %arg4: memref<32x128xbf16, #tpu.memory_space<vmem>>, %arg5: memref<1x128xf32, #tpu.memory_space<vmem>>, %arg6: memref<16x128xbf16, #tpu.memory_space<vmem>>, %arg7: memref<16x128xf32, #tpu.memory_space<vmem>>) attributes {dimension_semantics = [#tpu.dimension_semantics<parallel>, #tpu.dimension_semantics<parallel>, #tpu.dimension_semantics<arbitrary>], iteration_bounds = array<i64: 1, 1, 1>, scalar_prefetch = 0 : i64, scratch_operands = 1 : i64, tpu.core_type = #tpu.core_type<tc>, window_params = [{transform_indices = @transform_0, window_bounds = array<i64: 16, 32>}, {transform_indices = @transform_1, window_bounds = array<i64: 32, 128>}, {transform_indices = @transform_2, window_bounds = array<i64: 1, 128>}, {transform_indices = @transform_3, window_bounds = array<i64: 16, 128>}]} {
    %c0_i32 = arith.constant 0 : i32
    %0 = arith.cmpi eq, %arg2, %c0_i32 : i32
    %1 = arith.extui %0 : i1 to i32
    %c0_i32_0 = arith.constant 0 : i32
    %2 = arith.cmpi ne, %1, %c0_i32_0 : i32
    scf.if %2 {
      %cst_10 = arith.constant 0.000000e+00 : f32
      %12 = vector.broadcast %cst_10 : f32 to vector<16x128xf32>
      %c0_11 = arith.constant 0 : index
      %c0_12 = arith.constant 0 : index
      %13 = vector.load %arg7[%c0_11, %c0_12] : memref<16x128xf32, #tpu.memory_space<vmem>>, vector<16x128xf32>
      tpu.vector_store %arg7[%c0_11, %c0_12], %12 {strides = array<i32>} : memref<16x128xf32, #tpu.memory_space<vmem>>, vector<16x128xf32>,
    } else {
    }
    %c0 = arith.constant 0 : index
    %c0_1 = arith.constant 0 : index
    %3 = vector.load %arg7[%c0, %c0_1] : memref<16x128xf32, #tpu.memory_space<vmem>>, vector<16x128xf32>
    %c0_2 = arith.constant 0 : index
    %c0_3 = arith.constant 0 : index
    %4 = vector.load %arg3[%c0_2, %c0_3] : memref<16x32xbf16, #tpu.memory_space<vmem>>, vector<16x32xbf16>
    %c0_4 = arith.constant 0 : index
    %c0_5 = arith.constant 0 : index
    %5 = vector.load %arg4[%c0_4, %c0_5] : memref<32x128xbf16, #tpu.memory_space<vmem>>, vector<32x128xbf16>
    %cst = arith.constant dense<0.000000e+00> : vector<16x128xf32>
    %6 = tpu.matmul %4, %5, %cst {dimension_numbers = #tpu.dot_dimension_numbers<[1], [0], [0], [1], [0, 0, 1, 1], [], []>} : vector<16x32xbf16>, vector<32x128xbf16>, vector<16x128xf32> -> vector<16x128xf32>
    %7 = arith.addf %3, %6 : vector<16x128xf32>
    %c0_6 = arith.constant 0 : index
    %c0_7 = arith.constant 0 : index
    %8 = vector.load %arg7[%c0_6, %c0_7] : memref<16x128xf32, #tpu.memory_space<vmem>>, vector<16x128xf32>
    tpu.vector_store %arg7[%c0_6, %c0_7], %7 {strides = array<i32>} : memref<16x128xf32, #tpu.memory_space<vmem>>, vector<16x128xf32>,
    %c0_i32_8 = arith.constant 0 : i32
    %9 = arith.cmpi eq, %arg2, %c0_i32_8 : i32
    %10 = arith.extui %9 : i1 to i32
    %c0_i32_9 = arith.constant 0 : i32
    %11 = arith.cmpi ne, %10, %c0_i32_9 : i32
    scf.if %11 {
      %c0_10 = arith.constant 0 : index
      %c0_11 = arith.constant 0 : index
      %12 = vector.load %arg7[%c0_10, %c0_11] : memref<16x128xf32, #tpu.memory_space<vmem>>, vector<16x128xf32>
      %c0_12 = arith.constant 0 : index
      %c0_13 = arith.constant 0 : index
      %13 = vector.load %arg5[%c0_12, %c0_13] : memref<1x128xf32, #tpu.memory_space<vmem>>, vector<1x128xf32>
      %14 = vector.broadcast %13 : vector<1x128xf32> to vector<16x128xf32>
      %15 = arith.addf %12, %14 : vector<16x128xf32>
      %16 = arith.truncf %15 : vector<16x128xf32> to vector<16x128xbf16>
      %c0_14 = arith.constant 0 : index
      %c0_15 = arith.constant 0 : index
      %17 = vector.load %arg6[%c0_14, %c0_15] : memref<16x128xbf16, #tpu.memory_space<vmem>>, vector<16x128xbf16>
      tpu.vector_store %arg6[%c0_14, %c0_15], %16 {strides = array<i32>} : memref<16x128xbf16, #tpu.memory_space<vmem>>, vector<16x128xbf16>,
    } else {
    }
    return
  }
  func.func @transform_0(%arg0: i32, %arg1: i32, %arg2: i32) -> (i32, i32) {
    %c0_i32 = arith.constant 0 : i32
    return %arg0, %arg2 : i32, i32
  }
  func.func @transform_1(%arg0: i32, %arg1: i32, %arg2: i32) -> (i32, i32) {
    %c0_i32 = arith.constant 0 : i32
    return %arg2, %arg1 : i32, i32
  }
  func.func @transform_2(%arg0: i32, %arg1: i32, %arg2: i32) -> (i32, i32) {
    %c0_i32 = arith.constant 0 : i32
    %c0_i32_0 = arith.constant 0 : i32
    return %c0_i32, %arg1 : i32, i32
  }
  func.func @transform_3(%arg0: i32, %arg1: i32, %arg2: i32) -> (i32, i32) {
    %c0_i32 = arith.constant 0 : i32
    return %arg0, %arg1 : i32, i32
  }
}

module attributes {stable_mosaic.version = 11 : i64} {
  func.func @_self_attn_kernel(%arg0: i32, %arg1: memref<1x8x96xbf16, #tpu.memory_space<vmem>>, %arg2: memref<1x8x32xbf16, #tpu.memory_space<vmem>>) attributes {dimension_semantics = [#tpu.dimension_semantics<parallel>], iteration_bounds = array<i64: 2>, scalar_prefetch = 0 : i64, scratch_operands = 0 : i64, tpu.core_type = #tpu.core_type<tc>, window_params = [{transform_indices = @transform_0, window_bounds = array<i64: 1, 8, 96>}, {transform_indices = @transform_1, window_bounds = array<i64: 1, 8, 32>}]} {
    %c0 = arith.constant 0 : index
    %c0_0 = arith.constant 0 : index
    %c0_1 = arith.constant 0 : index
    %0 = vector.load %arg1[%c0, %c0_0, %c0_1] : memref<1x8x96xbf16, #tpu.memory_space<vmem>>, vector<1x8x96xbf16>
    %1 = vector.shape_cast %0 : vector<1x8x96xbf16> to vector<8x96xbf16>
    %2 = vector.extract_strided_slice %1 {offsets = [0, 0], sizes = [8, 32], strides = [1, 1]} : vector<8x96xbf16> to vector<8x32xbf16>
    %3 = vector.extract_strided_slice %1 {offsets = [0, 32], sizes = [8, 32], strides = [1, 1]} : vector<8x96xbf16> to vector<8x32xbf16>
    %4 = vector.extract_strided_slice %1 {offsets = [0, 64], sizes = [8, 32], strides = [1, 1]} : vector<8x96xbf16> to vector<8x32xbf16>
    %5 = tpu.iota {dimensions = array<i32: 0>} : vector<8x8xi32>
    %6 = tpu.iota {dimensions = array<i32: 1>} : vector<8x8xi32>
    %7 = arith.cmpi sgt, %6, %5 : vector<8x8xi32>
    %cst = arith.constant -1.000000e+30 : f32
    %cst_2 = arith.constant 0.000000e+00 : f32
    %8 = vector.broadcast %cst : f32 to vector<8x8xf32>
    %9 = vector.broadcast %cst_2 : f32 to vector<8x8xf32>
    %10 = arith.select %7, %8, %9 : vector<8x8xi1>, vector<8x8xf32>
    %11 = vector.extract_strided_slice %2 {offsets = [0, 0], sizes = [8, 8], strides = [1, 1]} : vector<8x32xbf16> to vector<8x8xbf16>
    %12 = vector.extract_strided_slice %3 {offsets = [0, 0], sizes = [8, 8], strides = [1, 1]} : vector<8x32xbf16> to vector<8x8xbf16>
    %13 = vector.extract_strided_slice %4 {offsets = [0, 0], sizes = [8, 8], strides = [1, 1]} : vector<8x32xbf16> to vector<8x8xbf16>
    %cst_3 = arith.constant dense<0.000000e+00> : vector<8x8xf32>
    %14 = tpu.matmul %11, %12, %cst_3 {dimension_numbers = #tpu.dot_dimension_numbers<[1], [1], [0], [0], [0, 0, 1, 0], [], []>} : vector<8x8xbf16>, vector<8x8xbf16>, vector<8x8xf32> -> vector<8x8xf32>
    %cst_4 = arith.constant 0.353553385 : f32
    %15 = vector.broadcast %cst_4 : f32 to vector<8x8xf32>
    %16 = arith.mulf %14, %15 : vector<8x8xf32>
    %17 = arith.addf %16, %10 : vector<8x8xf32>
    %cst_5 = arith.constant dense<0xFF800000> : vector<8xf32>
    %18 = vector.multi_reduction <maximumf>, %17, %cst_5 [1] : vector<8x8xf32> to vector<8xf32>
    %19 = vector.shape_cast %18 : vector<8xf32> to vector<8x1xf32>
    %20 = vector.broadcast %19 : vector<8x1xf32> to vector<8x8xf32>
    %21 = arith.subf %17, %20 : vector<8x8xf32>
    %22 = math.exp %21 : vector<8x8xf32>
    %cst_6 = arith.constant dense<0.000000e+00> : vector<8xf32>
    %23 = vector.multi_reduction <add>, %22, %cst_6 [1] : vector<8x8xf32> to vector<8xf32>
    %24 = vector.shape_cast %23 : vector<8xf32> to vector<8x1xf32>
    %25 = tpu.reciprocal %24 {approx = true} : vector<8x1xf32> -> vector<8x1xf32>
    %26 = vector.broadcast %25 : vector<8x1xf32> to vector<8x8xf32>
    %27 = arith.mulf %22, %26 : vector<8x8xf32>
    %28 = arith.truncf %27 : vector<8x8xf32> to vector<8x8xbf16>
    %cst_7 = arith.constant dense<0.000000e+00> : vector<8x8xf32>
    %29 = tpu.matmul %28, %13, %cst_7 {dimension_numbers = #tpu.dot_dimension_numbers<[1], [0], [0], [1], [0, 0, 1, 1], [], []>} : vector<8x8xbf16>, vector<8x8xbf16>, vector<8x8xf32> -> vector<8x8xf32>
    %30 = vector.extract_strided_slice %2 {offsets = [0, 8], sizes = [8, 8], strides = [1, 1]} : vector<8x32xbf16> to vector<8x8xbf16>
    %31 = vector.extract_strided_slice %3 {offsets = [0, 8], sizes = [8, 8], strides = [1, 1]} : vector<8x32xbf16> to vector<8x8xbf16>
    %32 = vector.extract_strided_slice %4 {offsets = [0, 8], sizes = [8, 8], strides = [1, 1]} : vector<8x32xbf16> to vector<8x8xbf16>
    %cst_8 = arith.constant dense<0.000000e+00> : vector<8x8xf32>
    %33 = tpu.matmul %30, %31, %cst_8 {dimension_numbers = #tpu.dot_dimension_numbers<[1], [1], [0], [0], [0, 0, 1, 0], [], []>} : vector<8x8xbf16>, vector<8x8xbf16>, vector<8x8xf32> -> vector<8x8xf32>
    %cst_9 = arith.constant 0.353553385 : f32
    %34 = vector.broadcast %cst_9 : f32 to vector<8x8xf32>
    %35 = arith.mulf %33, %34 : vector<8x8xf32>
    %36 = arith.addf %35, %10 : vector<8x8xf32>
    %cst_10 = arith.constant dense<0xFF800000> : vector<8xf32>
    %37 = vector.multi_reduction <maximumf>, %36, %cst_10 [1] : vector<8x8xf32> to vector<8xf32>
    %38 = vector.shape_cast %37 : vector<8xf32> to vector<8x1xf32>
    %39 = vector.broadcast %38 : vector<8x1xf32> to vector<8x8xf32>
    %40 = arith.subf %36, %39 : vector<8x8xf32>
    %41 = math.exp %40 : vector<8x8xf32>
    %cst_11 = arith.constant dense<0.000000e+00> : vector<8xf32>
    %42 = vector.multi_reduction <add>, %41, %cst_11 [1] : vector<8x8xf32> to vector<8xf32>
    %43 = vector.shape_cast %42 : vector<8xf32> to vector<8x1xf32>
    %44 = tpu.reciprocal %43 {approx = true} : vector<8x1xf32> -> vector<8x1xf32>
    %45 = vector.broadcast %44 : vector<8x1xf32> to vector<8x8xf32>
    %46 = arith.mulf %41, %45 : vector<8x8xf32>
    %47 = arith.truncf %46 : vector<8x8xf32> to vector<8x8xbf16>
    %cst_12 = arith.constant dense<0.000000e+00> : vector<8x8xf32>
    %48 = tpu.matmul %47, %32, %cst_12 {dimension_numbers = #tpu.dot_dimension_numbers<[1], [0], [0], [1], [0, 0, 1, 1], [], []>} : vector<8x8xbf16>, vector<8x8xbf16>, vector<8x8xf32> -> vector<8x8xf32>
    %49 = vector.extract_strided_slice %2 {offsets = [0, 16], sizes = [8, 8], strides = [1, 1]} : vector<8x32xbf16> to vector<8x8xbf16>
    %50 = vector.extract_strided_slice %3 {offsets = [0, 16], sizes = [8, 8], strides = [1, 1]} : vector<8x32xbf16> to vector<8x8xbf16>
    %51 = vector.extract_strided_slice %4 {offsets = [0, 16], sizes = [8, 8], strides = [1, 1]} : vector<8x32xbf16> to vector<8x8xbf16>
    %cst_13 = arith.constant dense<0.000000e+00> : vector<8x8xf32>
    %52 = tpu.matmul %49, %50, %cst_13 {dimension_numbers = #tpu.dot_dimension_numbers<[1], [1], [0], [0], [0, 0, 1, 0], [], []>} : vector<8x8xbf16>, vector<8x8xbf16>, vector<8x8xf32> -> vector<8x8xf32>
    %cst_14 = arith.constant 0.353553385 : f32
    %53 = vector.broadcast %cst_14 : f32 to vector<8x8xf32>
    %54 = arith.mulf %52, %53 : vector<8x8xf32>
    %55 = arith.addf %54, %10 : vector<8x8xf32>
    %cst_15 = arith.constant dense<0xFF800000> : vector<8xf32>
    %56 = vector.multi_reduction <maximumf>, %55, %cst_15 [1] : vector<8x8xf32> to vector<8xf32>
    %57 = vector.shape_cast %56 : vector<8xf32> to vector<8x1xf32>
    %58 = vector.broadcast %57 : vector<8x1xf32> to vector<8x8xf32>
    %59 = arith.subf %55, %58 : vector<8x8xf32>
    %60 = math.exp %59 : vector<8x8xf32>
    %cst_16 = arith.constant dense<0.000000e+00> : vector<8xf32>
    %61 = vector.multi_reduction <add>, %60, %cst_16 [1] : vector<8x8xf32> to vector<8xf32>
    %62 = vector.shape_cast %61 : vector<8xf32> to vector<8x1xf32>
    %63 = tpu.reciprocal %62 {approx = true} : vector<8x1xf32> -> vector<8x1xf32>
    %64 = vector.broadcast %63 : vector<8x1xf32> to vector<8x8xf32>
    %65 = arith.mulf %60, %64 : vector<8x8xf32>
    %66 = arith.truncf %65 : vector<8x8xf32> to vector<8x8xbf16>
    %cst_17 = arith.constant dense<0.000000e+00> : vector<8x8xf32>
    %67 = tpu.matmul %66, %51, %cst_17 {dimension_numbers = #tpu.dot_dimension_numbers<[1], [0], [0], [1], [0, 0, 1, 1], [], []>} : vector<8x8xbf16>, vector<8x8xbf16>, vector<8x8xf32> -> vector<8x8xf32>
    %68 = vector.extract_strided_slice %2 {offsets = [0, 24], sizes = [8, 8], strides = [1, 1]} : vector<8x32xbf16> to vector<8x8xbf16>
    %69 = vector.extract_strided_slice %3 {offsets = [0, 24], sizes = [8, 8], strides = [1, 1]} : vector<8x32xbf16> to vector<8x8xbf16>
    %70 = vector.extract_strided_slice %4 {offsets = [0, 24], sizes = [8, 8], strides = [1, 1]} : vector<8x32xbf16> to vector<8x8xbf16>
    %cst_18 = arith.constant dense<0.000000e+00> : vector<8x8xf32>
    %71 = tpu.matmul %68, %69, %cst_18 {dimension_numbers = #tpu.dot_dimension_numbers<[1], [1], [0], [0], [0, 0, 1, 0], [], []>} : vector<8x8xbf16>, vector<8x8xbf16>, vector<8x8xf32> -> vector<8x8xf32>
    %cst_19 = arith.constant 0.353553385 : f32
    %72 = vector.broadcast %cst_19 : f32 to vector<8x8xf32>
    %73 = arith.mulf %71, %72 : vector<8x8xf32>
    %74 = arith.addf %73, %10 : vector<8x8xf32>
    %cst_20 = arith.constant dense<0xFF800000> : vector<8xf32>
    %75 = vector.multi_reduction <maximumf>, %74, %cst_20 [1] : vector<8x8xf32> to vector<8xf32>
    %76 = vector.shape_cast %75 : vector<8xf32> to vector<8x1xf32>
    %77 = vector.broadcast %76 : vector<8x1xf32> to vector<8x8xf32>
    %78 = arith.subf %74, %77 : vector<8x8xf32>
    %79 = math.exp %78 : vector<8x8xf32>
    %cst_21 = arith.constant dense<0.000000e+00> : vector<8xf32>
    %80 = vector.multi_reduction <add>, %79, %cst_21 [1] : vector<8x8xf32> to vector<8xf32>
    %81 = vector.shape_cast %80 : vector<8xf32> to vector<8x1xf32>
    %82 = tpu.reciprocal %81 {approx = true} : vector<8x1xf32> -> vector<8x1xf32>
    %83 = vector.broadcast %82 : vector<8x1xf32> to vector<8x8xf32>
    %84 = arith.mulf %79, %83 : vector<8x8xf32>
    %85 = arith.truncf %84 : vector<8x8xf32> to vector<8x8xbf16>
    %cst_22 = arith.constant dense<0.000000e+00> : vector<8x8xf32>
    %86 = tpu.matmul %85, %70, %cst_22 {dimension_numbers = #tpu.dot_dimension_numbers<[1], [0], [0], [1], [0, 0, 1, 1], [], []>} : vector<8x8xbf16>, vector<8x8xbf16>, vector<8x8xf32> -> vector<8x8xf32>
    %87 = tpu.concatenate %29, %48, %67, %86 in 1 : vector<8x8xf32>, vector<8x8xf32>, vector<8x8xf32>, vector<8x8xf32> -> vector<8x32xf32>
    %88 = arith.truncf %87 : vector<8x32xf32> to vector<8x32xbf16>
    %c0_23 = arith.constant 0 : index
    %c0_24 = arith.constant 0 : index
    %c0_25 = arith.constant 0 : index
    %89 = vector.load %arg2[%c0_23, %c0_24, %c0_25] : memref<1x8x32xbf16, #tpu.memory_space<vmem>>, vector<1x8x32xbf16>
    %90 = vector.shape_cast %89 : vector<1x8x32xbf16> to vector<8x32xbf16>
    %91 = vector.shape_cast %88 : vector<8x32xbf16> to vector<1x8x32xbf16>
    tpu.vector_store %arg2[%c0_23, %c0_24, %c0_25], %91 {strides = array<i32>} : memref<1x8x32xbf16, #tpu.memory_space<vmem>>, vector<1x8x32xbf16>,
    return
  }
  func.func @transform_0(%arg0: i32) -> (i32, i32, i32) {
    %c0_i32 = arith.constant 0 : i32
    %c0_i32_0 = arith.constant 0 : i32
    %c0_i32_1 = arith.constant 0 : i32
    return %arg0, %c0_i32, %c0_i32_0 : i32, i32, i32
  }
  func.func @transform_1(%arg0: i32) -> (i32, i32, i32) {
    %c0_i32 = arith.constant 0 : i32
    %c0_i32_0 = arith.constant 0 : i32
    %c0_i32_1 = arith.constant 0 : i32
    return %arg0, %c0_i32, %c0_i32_0 : i32, i32, i32
  }
}

module attributes {stable_mosaic.version = 11 : i64} {
  func.func @_add_ln_kernel(%arg0: i32, %arg1: memref<16x32xf32, #tpu.memory_space<vmem>>, %arg2: memref<16x32xf32, #tpu.memory_space<vmem>>, %arg3: memref<1x32xf32, #tpu.memory_space<vmem>>, %arg4: memref<1x32xf32, #tpu.memory_space<vmem>>, %arg5: memref<16x32xf32, #tpu.memory_space<vmem>>) attributes {dimension_semantics = [#tpu.dimension_semantics<parallel>], iteration_bounds = array<i64: 1>, scalar_prefetch = 0 : i64, scratch_operands = 0 : i64, tpu.core_type = #tpu.core_type<tc>, window_params = [{transform_indices = @transform_0, window_bounds = array<i64: 16, 32>}, {transform_indices = @transform_1, window_bounds = array<i64: 16, 32>}, {pipeline_mode = #tpu.pipeline_mode<synchronous>, transform_indices = @transform_2, window_bounds = array<i64: 1, 32>}, {pipeline_mode = #tpu.pipeline_mode<synchronous>, transform_indices = @transform_3, window_bounds = array<i64: 1, 32>}, {transform_indices = @transform_4, window_bounds = array<i64: 16, 32>}]} {
    %c0 = arith.constant 0 : index
    %c0_0 = arith.constant 0 : index
    %0 = vector.load %arg1[%c0, %c0_0] : memref<16x32xf32, #tpu.memory_space<vmem>>, vector<16x32xf32>
    %c0_1 = arith.constant 0 : index
    %c0_2 = arith.constant 0 : index
    %1 = vector.load %arg2[%c0_1, %c0_2] : memref<16x32xf32, #tpu.memory_space<vmem>>, vector<16x32xf32>
    %2 = arith.addf %0, %1 : vector<16x32xf32>
    %cst = arith.constant dense<0.000000e+00> : vector<16xf32>
    %3 = vector.multi_reduction <add>, %2, %cst [1] : vector<16x32xf32> to vector<16xf32>
    %4 = vector.shape_cast %3 : vector<16xf32> to vector<16x1xf32>
    %cst_3 = arith.constant 3.200000e+01 : f32
    %5 = vector.broadcast %cst_3 : f32 to vector<16x1xf32>
    %6 = arith.divf %4, %5 : vector<16x1xf32>
    %7 = vector.broadcast %6 : vector<16x1xf32> to vector<16x32xf32>
    %8 = arith.subf %2, %7 : vector<16x32xf32>
    %9 = arith.mulf %8, %8 : vector<16x32xf32>
    %cst_4 = arith.constant dense<0.000000e+00> : vector<16xf32>
    %10 = vector.multi_reduction <add>, %9, %cst_4 [1] : vector<16x32xf32> to vector<16xf32>
    %11 = vector.shape_cast %10 : vector<16xf32> to vector<16x1xf32>
    %cst_5 = arith.constant 3.200000e+01 : f32
    %12 = vector.broadcast %cst_5 : f32 to vector<16x1xf32>
    %13 = arith.divf %11, %12 : vector<16x1xf32>
    %cst_6 = arith.constant 9.99999974E-6 : f32
    %14 = vector.broadcast %cst_6 : f32 to vector<16x1xf32>
    %15 = arith.addf %13, %14 : vector<16x1xf32>
    %16 = math.rsqrt %15 : vector<16x1xf32>
    %17 = vector.broadcast %16 : vector<16x1xf32> to vector<16x32xf32>
    %18 = arith.mulf %8, %17 : vector<16x32xf32>
    %c0_7 = arith.constant 0 : index
    %c0_8 = arith.constant 0 : index
    %19 = vector.load %arg3[%c0_7, %c0_8] : memref<1x32xf32, #tpu.memory_space<vmem>>, vector<1x32xf32>
    %20 = vector.broadcast %19 : vector<1x32xf32> to vector<16x32xf32>
    %21 = arith.mulf %18, %20 : vector<16x32xf32>
    %c0_9 = arith.constant 0 : index
    %c0_10 = arith.constant 0 : index
    %22 = vector.load %arg4[%c0_9, %c0_10] : memref<1x32xf32, #tpu.memory_space<vmem>>, vector<1x32xf32>
    %23 = vector.broadcast %22 : vector<1x32xf32> to vector<16x32xf32>
    %24 = arith.addf %21, %23 : vector<16x32xf32>
    %c0_11 = arith.constant 0 : index
    %c0_12 = arith.constant 0 : index
    %25 = vector.load %arg5[%c0_11, %c0_12] : memref<16x32xf32, #tpu.memory_space<vmem>>, vector<16x32xf32>
    tpu.vector_store %arg5[%c0_11, %c0_12], %24 {strides = array<i32>} : memref<16x32xf32, #tpu.memory_space<vmem>>, vector<16x32xf32>,
    return
  }
  func.func @transform_0(%arg0: i32) -> (i32, i32) {
    %c0_i32 = arith.constant 0 : i32
    %c0_i32_0 = arith.constant 0 : i32
    return %arg0, %c0_i32 : i32, i32
  }
  func.func @transform_1(%arg0: i32) -> (i32, i32) {
    %c0_i32 = arith.constant 0 : i32
    %c0_i32_0 = arith.constant 0 : i32
    return %arg0, %c0_i32 : i32, i32
  }
  func.func @transform_2(%arg0: i32) -> (i32, i32) {
    %c0_i32 = arith.constant 0 : i32
    %c0_i32_0 = arith.constant 0 : i32
    %c0_i32_1 = arith.constant 0 : i32
    return %c0_i32, %c0_i32_0 : i32, i32
  }
  func.func @transform_3(%arg0: i32) -> (i32, i32) {
    %c0_i32 = arith.constant 0 : i32
    %c0_i32_0 = arith.constant 0 : i32
    %c0_i32_1 = arith.constant 0 : i32
    return %c0_i32, %c0_i32_0 : i32, i32
  }
  func.func @transform_4(%arg0: i32) -> (i32, i32) {
    %c0_i32 = arith.constant 0 : i32
    %c0_i32_0 = arith.constant 0 : i32
    return %arg0, %c0_i32 : i32, i32
  }
}

module attributes {stable_mosaic.version = 11 : i64} {
  func.func @_linear_kernel(%arg0: i32, %arg1: i32, %arg2: i32, %arg3: memref<16x32xbf16, #tpu.memory_space<vmem>>, %arg4: memref<32x128xbf16, #tpu.memory_space<vmem>>, %arg5: memref<1x128xf32, #tpu.memory_space<vmem>>, %arg6: memref<16x128xf32, #tpu.memory_space<vmem>>, %arg7: memref<16x128xf32, #tpu.memory_space<vmem>>) attributes {dimension_semantics = [#tpu.dimension_semantics<parallel>, #tpu.dimension_semantics<parallel>, #tpu.dimension_semantics<arbitrary>], iteration_bounds = array<i64: 1, 1, 1>, scalar_prefetch = 0 : i64, scratch_operands = 1 : i64, tpu.core_type = #tpu.core_type<tc>, window_params = [{transform_indices = @transform_0, window_bounds = array<i64: 16, 32>}, {transform_indices = @transform_1, window_bounds = array<i64: 32, 128>}, {transform_indices = @transform_2, window_bounds = array<i64: 1, 128>}, {transform_indices = @transform_3, window_bounds = array<i64: 16, 128>}]} {
    %c0_i32 = arith.constant 0 : i32
    %0 = arith.cmpi eq, %arg2, %c0_i32 : i32
    %1 = arith.extui %0 : i1 to i32
    %c0_i32_0 = arith.constant 0 : i32
    %2 = arith.cmpi ne, %1, %c0_i32_0 : i32
    scf.if %2 {
      %cst_10 = arith.constant 0.000000e+00 : f32
      %12 = vector.broadcast %cst_10 : f32 to vector<16x128xf32>
      %c0_11 = arith.constant 0 : index
      %c0_12 = arith.constant 0 : index
      %13 = vector.load %arg7[%c0_11, %c0_12] : memref<16x128xf32, #tpu.memory_space<vmem>>, vector<16x128xf32>
      tpu.vector_store %arg7[%c0_11, %c0_12], %12 {strides = array<i32>} : memref<16x128xf32, #tpu.memory_space<vmem>>, vector<16x128xf32>,
    } else {
    }
    %c0 = arith.constant 0 : index
    %c0_1 = arith.constant 0 : index
    %3 = vector.load %arg7[%c0, %c0_1] : memref<16x128xf32, #tpu.memory_space<vmem>>, vector<16x128xf32>
    %c0_2 = arith.constant 0 : index
    %c0_3 = arith.constant 0 : index
    %4 = vector.load %arg3[%c0_2, %c0_3] : memref<16x32xbf16, #tpu.memory_space<vmem>>, vector<16x32xbf16>
    %c0_4 = arith.constant 0 : index
    %c0_5 = arith.constant 0 : index
    %5 = vector.load %arg4[%c0_4, %c0_5] : memref<32x128xbf16, #tpu.memory_space<vmem>>, vector<32x128xbf16>
    %cst = arith.constant dense<0.000000e+00> : vector<16x128xf32>
    %6 = tpu.matmul %4, %5, %cst {dimension_numbers = #tpu.dot_dimension_numbers<[1], [0], [0], [1], [0, 0, 1, 1], [], []>} : vector<16x32xbf16>, vector<32x128xbf16>, vector<16x128xf32> -> vector<16x128xf32>
    %7 = arith.addf %3, %6 : vector<16x128xf32>
    %c0_6 = arith.constant 0 : index
    %c0_7 = arith.constant 0 : index
    %8 = vector.load %arg7[%c0_6, %c0_7] : memref<16x128xf32, #tpu.memory_space<vmem>>, vector<16x128xf32>
    tpu.vector_store %arg7[%c0_6, %c0_7], %7 {strides = array<i32>} : memref<16x128xf32, #tpu.memory_space<vmem>>, vector<16x128xf32>,
    %c0_i32_8 = arith.constant 0 : i32
    %9 = arith.cmpi eq, %arg2, %c0_i32_8 : i32
    %10 = arith.extui %9 : i1 to i32
    %c0_i32_9 = arith.constant 0 : i32
    %11 = arith.cmpi ne, %10, %c0_i32_9 : i32
    scf.if %11 {
      %c0_10 = arith.constant 0 : index
      %c0_11 = arith.constant 0 : index
      %12 = vector.load %arg7[%c0_10, %c0_11] : memref<16x128xf32, #tpu.memory_space<vmem>>, vector<16x128xf32>
      %c0_12 = arith.constant 0 : index
      %c0_13 = arith.constant 0 : index
      %13 = vector.load %arg5[%c0_12, %c0_13] : memref<1x128xf32, #tpu.memory_space<vmem>>, vector<1x128xf32>
      %14 = vector.broadcast %13 : vector<1x128xf32> to vector<16x128xf32>
      %15 = arith.addf %12, %14 : vector<16x128xf32>
      %c0_14 = arith.constant 0 : index
      %c0_15 = arith.constant 0 : index
      %16 = vector.load %arg6[%c0_14, %c0_15] : memref<16x128xf32, #tpu.memory_space<vmem>>, vector<16x128xf32>
      tpu.vector_store %arg6[%c0_14, %c0_15], %15 {strides = array<i32>} : memref<16x128xf32, #tpu.memory_space<vmem>>, vector<16x128xf32>,
    } else {
    }
    return
  }
  func.func @transform_0(%arg0: i32, %arg1: i32, %arg2: i32) -> (i32, i32) {
    %c0_i32 = arith.constant 0 : i32
    return %arg0, %arg2 : i32, i32
  }
  func.func @transform_1(%arg0: i32, %arg1: i32, %arg2: i32) -> (i32, i32) {
    %c0_i32 = arith.constant 0 : i32
    return %arg2, %arg1 : i32, i32
  }
  func.func @transform_2(%arg0: i32, %arg1: i32, %arg2: i32) -> (i32, i32) {
    %c0_i32 = arith.constant 0 : i32
    %c0_i32_0 = arith.constant 0 : i32
    return %c0_i32, %arg1 : i32, i32
  }
  func.func @transform_3(%arg0: i32, %arg1: i32, %arg2: i32) -> (i32, i32) {
    %c0_i32 = arith.constant 0 : i32
    return %arg0, %arg1 : i32, i32
  }
}

module attributes {stable_mosaic.version = 11 : i64} {
  func.func @_cross_attn_kernel(%arg0: i32, %arg1: memref<1x8x32xbf16, #tpu.memory_space<vmem>>, %arg2: memref<1x8x64xbf16, #tpu.memory_space<vmem>>, %arg3: memref<1x8x32xbf16, #tpu.memory_space<vmem>>) attributes {dimension_semantics = [#tpu.dimension_semantics<parallel>], iteration_bounds = array<i64: 2>, scalar_prefetch = 0 : i64, scratch_operands = 0 : i64, tpu.core_type = #tpu.core_type<tc>, window_params = [{transform_indices = @transform_0, window_bounds = array<i64: 1, 8, 32>}, {transform_indices = @transform_1, window_bounds = array<i64: 1, 8, 64>}, {transform_indices = @transform_2, window_bounds = array<i64: 1, 8, 32>}]} {
    %c0 = arith.constant 0 : index
    %c0_0 = arith.constant 0 : index
    %c0_1 = arith.constant 0 : index
    %0 = vector.load %arg2[%c0, %c0_0, %c0_1] : memref<1x8x64xbf16, #tpu.memory_space<vmem>>, vector<1x8x64xbf16>
    %1 = vector.shape_cast %0 : vector<1x8x64xbf16> to vector<8x64xbf16>
    %c0_2 = arith.constant 0 : index
    %c0_3 = arith.constant 0 : index
    %c0_4 = arith.constant 0 : index
    %2 = vector.load %arg1[%c0_2, %c0_3, %c0_4] : memref<1x8x32xbf16, #tpu.memory_space<vmem>>, vector<1x8x32xbf16>
    %3 = vector.shape_cast %2 : vector<1x8x32xbf16> to vector<8x32xbf16>
    %4 = vector.extract_strided_slice %1 {offsets = [0, 0], sizes = [8, 32], strides = [1, 1]} : vector<8x64xbf16> to vector<8x32xbf16>
    %5 = vector.extract_strided_slice %1 {offsets = [0, 32], sizes = [8, 32], strides = [1, 1]} : vector<8x64xbf16> to vector<8x32xbf16>
    %6 = vector.extract_strided_slice %3 {offsets = [0, 0], sizes = [8, 8], strides = [1, 1]} : vector<8x32xbf16> to vector<8x8xbf16>
    %7 = vector.extract_strided_slice %4 {offsets = [0, 0], sizes = [8, 8], strides = [1, 1]} : vector<8x32xbf16> to vector<8x8xbf16>
    %8 = vector.extract_strided_slice %5 {offsets = [0, 0], sizes = [8, 8], strides = [1, 1]} : vector<8x32xbf16> to vector<8x8xbf16>
    %cst = arith.constant dense<0.000000e+00> : vector<8x8xf32>
    %9 = tpu.matmul %6, %7, %cst {dimension_numbers = #tpu.dot_dimension_numbers<[1], [1], [0], [0], [0, 0, 1, 0], [], []>} : vector<8x8xbf16>, vector<8x8xbf16>, vector<8x8xf32> -> vector<8x8xf32>
    %cst_5 = arith.constant 0.353553385 : f32
    %10 = vector.broadcast %cst_5 : f32 to vector<8x8xf32>
    %11 = arith.mulf %9, %10 : vector<8x8xf32>
    %cst_6 = arith.constant dense<0xFF800000> : vector<8xf32>
    %12 = vector.multi_reduction <maximumf>, %11, %cst_6 [1] : vector<8x8xf32> to vector<8xf32>
    %13 = vector.shape_cast %12 : vector<8xf32> to vector<8x1xf32>
    %14 = vector.broadcast %13 : vector<8x1xf32> to vector<8x8xf32>
    %15 = arith.subf %11, %14 : vector<8x8xf32>
    %16 = math.exp %15 : vector<8x8xf32>
    %cst_7 = arith.constant dense<0.000000e+00> : vector<8xf32>
    %17 = vector.multi_reduction <add>, %16, %cst_7 [1] : vector<8x8xf32> to vector<8xf32>
    %18 = vector.shape_cast %17 : vector<8xf32> to vector<8x1xf32>
    %19 = tpu.reciprocal %18 {approx = true} : vector<8x1xf32> -> vector<8x1xf32>
    %20 = vector.broadcast %19 : vector<8x1xf32> to vector<8x8xf32>
    %21 = arith.mulf %16, %20 : vector<8x8xf32>
    %22 = arith.truncf %21 : vector<8x8xf32> to vector<8x8xbf16>
    %cst_8 = arith.constant dense<0.000000e+00> : vector<8x8xf32>
    %23 = tpu.matmul %22, %8, %cst_8 {dimension_numbers = #tpu.dot_dimension_numbers<[1], [0], [0], [1], [0, 0, 1, 1], [], []>} : vector<8x8xbf16>, vector<8x8xbf16>, vector<8x8xf32> -> vector<8x8xf32>
    %24 = vector.extract_strided_slice %3 {offsets = [0, 8], sizes = [8, 8], strides = [1, 1]} : vector<8x32xbf16> to vector<8x8xbf16>
    %25 = vector.extract_strided_slice %4 {offsets = [0, 8], sizes = [8, 8], strides = [1, 1]} : vector<8x32xbf16> to vector<8x8xbf16>
    %26 = vector.extract_strided_slice %5 {offsets = [0, 8], sizes = [8, 8], strides = [1, 1]} : vector<8x32xbf16> to vector<8x8xbf16>
    %cst_9 = arith.constant dense<0.000000e+00> : vector<8x8xf32>
    %27 = tpu.matmul %24, %25, %cst_9 {dimension_numbers = #tpu.dot_dimension_numbers<[1], [1], [0], [0], [0, 0, 1, 0], [], []>} : vector<8x8xbf16>, vector<8x8xbf16>, vector<8x8xf32> -> vector<8x8xf32>
    %cst_10 = arith.constant 0.353553385 : f32
    %28 = vector.broadcast %cst_10 : f32 to vector<8x8xf32>
    %29 = arith.mulf %27, %28 : vector<8x8xf32>
    %cst_11 = arith.constant dense<0xFF800000> : vector<8xf32>
    %30 = vector.multi_reduction <maximumf>, %29, %cst_11 [1] : vector<8x8xf32> to vector<8xf32>
    %31 = vector.shape_cast %30 : vector<8xf32> to vector<8x1xf32>
    %32 = vector.broadcast %31 : vector<8x1xf32> to vector<8x8xf32>
    %33 = arith.subf %29, %32 : vector<8x8xf32>
    %34 = math.exp %33 : vector<8x8xf32>
    %cst_12 = arith.constant dense<0.000000e+00> : vector<8xf32>
    %35 = vector.multi_reduction <add>, %34, %cst_12 [1] : vector<8x8xf32> to vector<8xf32>
    %36 = vector.shape_cast %35 : vector<8xf32> to vector<8x1xf32>
    %37 = tpu.reciprocal %36 {approx = true} : vector<8x1xf32> -> vector<8x1xf32>
    %38 = vector.broadcast %37 : vector<8x1xf32> to vector<8x8xf32>
    %39 = arith.mulf %34, %38 : vector<8x8xf32>
    %40 = arith.truncf %39 : vector<8x8xf32> to vector<8x8xbf16>
    %cst_13 = arith.constant dense<0.000000e+00> : vector<8x8xf32>
    %41 = tpu.matmul %40, %26, %cst_13 {dimension_numbers = #tpu.dot_dimension_numbers<[1], [0], [0], [1], [0, 0, 1, 1], [], []>} : vector<8x8xbf16>, vector<8x8xbf16>, vector<8x8xf32> -> vector<8x8xf32>
    %42 = vector.extract_strided_slice %3 {offsets = [0, 16], sizes = [8, 8], strides = [1, 1]} : vector<8x32xbf16> to vector<8x8xbf16>
    %43 = vector.extract_strided_slice %4 {offsets = [0, 16], sizes = [8, 8], strides = [1, 1]} : vector<8x32xbf16> to vector<8x8xbf16>
    %44 = vector.extract_strided_slice %5 {offsets = [0, 16], sizes = [8, 8], strides = [1, 1]} : vector<8x32xbf16> to vector<8x8xbf16>
    %cst_14 = arith.constant dense<0.000000e+00> : vector<8x8xf32>
    %45 = tpu.matmul %42, %43, %cst_14 {dimension_numbers = #tpu.dot_dimension_numbers<[1], [1], [0], [0], [0, 0, 1, 0], [], []>} : vector<8x8xbf16>, vector<8x8xbf16>, vector<8x8xf32> -> vector<8x8xf32>
    %cst_15 = arith.constant 0.353553385 : f32
    %46 = vector.broadcast %cst_15 : f32 to vector<8x8xf32>
    %47 = arith.mulf %45, %46 : vector<8x8xf32>
    %cst_16 = arith.constant dense<0xFF800000> : vector<8xf32>
    %48 = vector.multi_reduction <maximumf>, %47, %cst_16 [1] : vector<8x8xf32> to vector<8xf32>
    %49 = vector.shape_cast %48 : vector<8xf32> to vector<8x1xf32>
    %50 = vector.broadcast %49 : vector<8x1xf32> to vector<8x8xf32>
    %51 = arith.subf %47, %50 : vector<8x8xf32>
    %52 = math.exp %51 : vector<8x8xf32>
    %cst_17 = arith.constant dense<0.000000e+00> : vector<8xf32>
    %53 = vector.multi_reduction <add>, %52, %cst_17 [1] : vector<8x8xf32> to vector<8xf32>
    %54 = vector.shape_cast %53 : vector<8xf32> to vector<8x1xf32>
    %55 = tpu.reciprocal %54 {approx = true} : vector<8x1xf32> -> vector<8x1xf32>
    %56 = vector.broadcast %55 : vector<8x1xf32> to vector<8x8xf32>
    %57 = arith.mulf %52, %56 : vector<8x8xf32>
    %58 = arith.truncf %57 : vector<8x8xf32> to vector<8x8xbf16>
    %cst_18 = arith.constant dense<0.000000e+00> : vector<8x8xf32>
    %59 = tpu.matmul %58, %44, %cst_18 {dimension_numbers = #tpu.dot_dimension_numbers<[1], [0], [0], [1], [0, 0, 1, 1], [], []>} : vector<8x8xbf16>, vector<8x8xbf16>, vector<8x8xf32> -> vector<8x8xf32>
    %60 = vector.extract_strided_slice %3 {offsets = [0, 24], sizes = [8, 8], strides = [1, 1]} : vector<8x32xbf16> to vector<8x8xbf16>
    %61 = vector.extract_strided_slice %4 {offsets = [0, 24], sizes = [8, 8], strides = [1, 1]} : vector<8x32xbf16> to vector<8x8xbf16>
    %62 = vector.extract_strided_slice %5 {offsets = [0, 24], sizes = [8, 8], strides = [1, 1]} : vector<8x32xbf16> to vector<8x8xbf16>
    %cst_19 = arith.constant dense<0.000000e+00> : vector<8x8xf32>
    %63 = tpu.matmul %60, %61, %cst_19 {dimension_numbers = #tpu.dot_dimension_numbers<[1], [1], [0], [0], [0, 0, 1, 0], [], []>} : vector<8x8xbf16>, vector<8x8xbf16>, vector<8x8xf32> -> vector<8x8xf32>
    %cst_20 = arith.constant 0.353553385 : f32
    %64 = vector.broadcast %cst_20 : f32 to vector<8x8xf32>
    %65 = arith.mulf %63, %64 : vector<8x8xf32>
    %cst_21 = arith.constant dense<0xFF800000> : vector<8xf32>
    %66 = vector.multi_reduction <maximumf>, %65, %cst_21 [1] : vector<8x8xf32> to vector<8xf32>
    %67 = vector.shape_cast %66 : vector<8xf32> to vector<8x1xf32>
    %68 = vector.broadcast %67 : vector<8x1xf32> to vector<8x8xf32>
    %69 = arith.subf %65, %68 : vector<8x8xf32>
    %70 = math.exp %69 : vector<8x8xf32>
    %cst_22 = arith.constant dense<0.000000e+00> : vector<8xf32>
    %71 = vector.multi_reduction <add>, %70, %cst_22 [1] : vector<8x8xf32> to vector<8xf32>
    %72 = vector.shape_cast %71 : vector<8xf32> to vector<8x1xf32>
    %73 = tpu.reciprocal %72 {approx = true} : vector<8x1xf32> -> vector<8x1xf32>
    %74 = vector.broadcast %73 : vector<8x1xf32> to vector<8x8xf32>
    %75 = arith.mulf %70, %74 : vector<8x8xf32>
    %76 = arith.truncf %75 : vector<8x8xf32> to vector<8x8xbf16>
    %cst_23 = arith.constant dense<0.000000e+00> : vector<8x8xf32>
    %77 = tpu.matmul %76, %62, %cst_23 {dimension_numbers = #tpu.dot_dimension_numbers<[1], [0], [0], [1], [0, 0, 1, 1], [], []>} : vector<8x8xbf16>, vector<8x8xbf16>, vector<8x8xf32> -> vector<8x8xf32>
    %78 = tpu.concatenate %23, %41, %59, %77 in 1 : vector<8x8xf32>, vector<8x8xf32>, vector<8x8xf32>, vector<8x8xf32> -> vector<8x32xf32>
    %79 = arith.truncf %78 : vector<8x32xf32> to vector<8x32xbf16>
    %c0_24 = arith.constant 0 : index
    %c0_25 = arith.constant 0 : index
    %c0_26 = arith.constant 0 : index
    %80 = vector.load %arg3[%c0_24, %c0_25, %c0_26] : memref<1x8x32xbf16, #tpu.memory_space<vmem>>, vector<1x8x32xbf16>
    %81 = vector.shape_cast %80 : vector<1x8x32xbf16> to vector<8x32xbf16>
    %82 = vector.shape_cast %79 : vector<8x32xbf16> to vector<1x8x32xbf16>
    tpu.vector_store %arg3[%c0_24, %c0_25, %c0_26], %82 {strides = array<i32>} : memref<1x8x32xbf16, #tpu.memory_space<vmem>>, vector<1x8x32xbf16>,
    return
  }
  func.func @transform_0(%arg0: i32) -> (i32, i32, i32) {
    %c0_i32 = arith.constant 0 : i32
    %c0_i32_0 = arith.constant 0 : i32
    %c0_i32_1 = arith.constant 0 : i32
    return %arg0, %c0_i32, %c0_i32_0 : i32, i32, i32
  }
  func.func @transform_1(%arg0: i32) -> (i32, i32, i32) {
    %c0_i32 = arith.constant 0 : i32
    %c0_i32_0 = arith.constant 0 : i32
    %c0_i32_1 = arith.constant 0 : i32
    return %arg0, %c0_i32, %c0_i32_0 : i32, i32, i32
  }
  func.func @transform_2(%arg0: i32) -> (i32, i32, i32) {
    %c0_i32 = arith.constant 0 : i32
    %c0_i32_0 = arith.constant 0 : i32
    %c0_i32_1 = arith.constant 0 : i32
    return %arg0, %c0_i32, %c0_i32_0 : i32, i32, i32
  }
}

module attributes {stable_mosaic.version = 11 : i64} {
  func.func @_linear_kernel(%arg0: i32, %arg1: i32, %arg2: i32, %arg3: memref<16x32xbf16, #tpu.memory_space<vmem>>, %arg4: memref<32x128xbf16, #tpu.memory_space<vmem>>, %arg5: memref<1x128xf32, #tpu.memory_space<vmem>>, %arg6: memref<16x128xbf16, #tpu.memory_space<vmem>>, %arg7: memref<16x128xf32, #tpu.memory_space<vmem>>) attributes {dimension_semantics = [#tpu.dimension_semantics<parallel>, #tpu.dimension_semantics<parallel>, #tpu.dimension_semantics<arbitrary>], iteration_bounds = array<i64: 1, 1, 1>, scalar_prefetch = 0 : i64, scratch_operands = 1 : i64, tpu.core_type = #tpu.core_type<tc>, window_params = [{transform_indices = @transform_0, window_bounds = array<i64: 16, 32>}, {transform_indices = @transform_1, window_bounds = array<i64: 32, 128>}, {transform_indices = @transform_2, window_bounds = array<i64: 1, 128>}, {transform_indices = @transform_3, window_bounds = array<i64: 16, 128>}]} {
    %c0_i32 = arith.constant 0 : i32
    %0 = arith.cmpi eq, %arg2, %c0_i32 : i32
    %1 = arith.extui %0 : i1 to i32
    %c0_i32_0 = arith.constant 0 : i32
    %2 = arith.cmpi ne, %1, %c0_i32_0 : i32
    scf.if %2 {
      %cst_10 = arith.constant 0.000000e+00 : f32
      %12 = vector.broadcast %cst_10 : f32 to vector<16x128xf32>
      %c0_11 = arith.constant 0 : index
      %c0_12 = arith.constant 0 : index
      %13 = vector.load %arg7[%c0_11, %c0_12] : memref<16x128xf32, #tpu.memory_space<vmem>>, vector<16x128xf32>
      tpu.vector_store %arg7[%c0_11, %c0_12], %12 {strides = array<i32>} : memref<16x128xf32, #tpu.memory_space<vmem>>, vector<16x128xf32>,
    } else {
    }
    %c0 = arith.constant 0 : index
    %c0_1 = arith.constant 0 : index
    %3 = vector.load %arg7[%c0, %c0_1] : memref<16x128xf32, #tpu.memory_space<vmem>>, vector<16x128xf32>
    %c0_2 = arith.constant 0 : index
    %c0_3 = arith.constant 0 : index
    %4 = vector.load %arg3[%c0_2, %c0_3] : memref<16x32xbf16, #tpu.memory_space<vmem>>, vector<16x32xbf16>
    %c0_4 = arith.constant 0 : index
    %c0_5 = arith.constant 0 : index
    %5 = vector.load %arg4[%c0_4, %c0_5] : memref<32x128xbf16, #tpu.memory_space<vmem>>, vector<32x128xbf16>
    %cst = arith.constant dense<0.000000e+00> : vector<16x128xf32>
    %6 = tpu.matmul %4, %5, %cst {dimension_numbers = #tpu.dot_dimension_numbers<[1], [0], [0], [1], [0, 0, 1, 1], [], []>} : vector<16x32xbf16>, vector<32x128xbf16>, vector<16x128xf32> -> vector<16x128xf32>
    %7 = arith.addf %3, %6 : vector<16x128xf32>
    %c0_6 = arith.constant 0 : index
    %c0_7 = arith.constant 0 : index
    %8 = vector.load %arg7[%c0_6, %c0_7] : memref<16x128xf32, #tpu.memory_space<vmem>>, vector<16x128xf32>
    tpu.vector_store %arg7[%c0_6, %c0_7], %7 {strides = array<i32>} : memref<16x128xf32, #tpu.memory_space<vmem>>, vector<16x128xf32>,
    %c0_i32_8 = arith.constant 0 : i32
    %9 = arith.cmpi eq, %arg2, %c0_i32_8 : i32
    %10 = arith.extui %9 : i1 to i32
    %c0_i32_9 = arith.constant 0 : i32
    %11 = arith.cmpi ne, %10, %c0_i32_9 : i32
    scf.if %11 {
      %c0_10 = arith.constant 0 : index
      %c0_11 = arith.constant 0 : index
      %12 = vector.load %arg7[%c0_10, %c0_11] : memref<16x128xf32, #tpu.memory_space<vmem>>, vector<16x128xf32>
      %c0_12 = arith.constant 0 : index
      %c0_13 = arith.constant 0 : index
      %13 = vector.load %arg5[%c0_12, %c0_13] : memref<1x128xf32, #tpu.memory_space<vmem>>, vector<1x128xf32>
      %14 = vector.broadcast %13 : vector<1x128xf32> to vector<16x128xf32>
      %15 = arith.addf %12, %14 : vector<16x128xf32>
      %cst_14 = arith.constant 0.000000e+00 : f32
      %16 = vector.broadcast %cst_14 : f32 to vector<16x128xf32>
      %17 = arith.maximumf %15, %16 : vector<16x128xf32>
      %18 = arith.truncf %17 : vector<16x128xf32> to vector<16x128xbf16>
      %c0_15 = arith.constant 0 : index
      %c0_16 = arith.constant 0 : index
      %19 = vector.load %arg6[%c0_15, %c0_16] : memref<16x128xbf16, #tpu.memory_space<vmem>>, vector<16x128xbf16>
      tpu.vector_store %arg6[%c0_15, %c0_16], %18 {strides = array<i32>} : memref<16x128xbf16, #tpu.memory_space<vmem>>, vector<16x128xbf16>,
    } else {
    }
    return
  }
  func.func @transform_0(%arg0: i32, %arg1: i32, %arg2: i32) -> (i32, i32) {
    %c0_i32 = arith.constant 0 : i32
    return %arg0, %arg2 : i32, i32
  }
  func.func @transform_1(%arg0: i32, %arg1: i32, %arg2: i32) -> (i32, i32) {
    %c0_i32 = arith.constant 0 : i32
    return %arg2, %arg1 : i32, i32
  }
  func.func @transform_2(%arg0: i32, %arg1: i32, %arg2: i32) -> (i32, i32) {
    %c0_i32 = arith.constant 0 : i32
    %c0_i32_0 = arith.constant 0 : i32
    return %c0_i32, %arg1 : i32, i32
  }
  func.func @transform_3(%arg0: i32, %arg1: i32, %arg2: i32) -> (i32, i32) {
    %c0_i32 = arith.constant 0 : i32
    return %arg0, %arg1 : i32, i32
  }
}

module attributes {stable_mosaic.version = 11 : i64} {
  func.func @_linear_kernel(%arg0: i32, %arg1: i32, %arg2: i32, %arg3: memref<16x64xbf16, #tpu.memory_space<vmem>>, %arg4: memref<64x128xbf16, #tpu.memory_space<vmem>>, %arg5: memref<1x128xf32, #tpu.memory_space<vmem>>, %arg6: memref<16x128xf32, #tpu.memory_space<vmem>>, %arg7: memref<16x128xf32, #tpu.memory_space<vmem>>) attributes {dimension_semantics = [#tpu.dimension_semantics<parallel>, #tpu.dimension_semantics<parallel>, #tpu.dimension_semantics<arbitrary>], iteration_bounds = array<i64: 1, 1, 1>, scalar_prefetch = 0 : i64, scratch_operands = 1 : i64, tpu.core_type = #tpu.core_type<tc>, window_params = [{transform_indices = @transform_0, window_bounds = array<i64: 16, 64>}, {transform_indices = @transform_1, window_bounds = array<i64: 64, 128>}, {transform_indices = @transform_2, window_bounds = array<i64: 1, 128>}, {transform_indices = @transform_3, window_bounds = array<i64: 16, 128>}]} {
    %c0_i32 = arith.constant 0 : i32
    %0 = arith.cmpi eq, %arg2, %c0_i32 : i32
    %1 = arith.extui %0 : i1 to i32
    %c0_i32_0 = arith.constant 0 : i32
    %2 = arith.cmpi ne, %1, %c0_i32_0 : i32
    scf.if %2 {
      %cst_10 = arith.constant 0.000000e+00 : f32
      %12 = vector.broadcast %cst_10 : f32 to vector<16x128xf32>
      %c0_11 = arith.constant 0 : index
      %c0_12 = arith.constant 0 : index
      %13 = vector.load %arg7[%c0_11, %c0_12] : memref<16x128xf32, #tpu.memory_space<vmem>>, vector<16x128xf32>
      tpu.vector_store %arg7[%c0_11, %c0_12], %12 {strides = array<i32>} : memref<16x128xf32, #tpu.memory_space<vmem>>, vector<16x128xf32>,
    } else {
    }
    %c0 = arith.constant 0 : index
    %c0_1 = arith.constant 0 : index
    %3 = vector.load %arg7[%c0, %c0_1] : memref<16x128xf32, #tpu.memory_space<vmem>>, vector<16x128xf32>
    %c0_2 = arith.constant 0 : index
    %c0_3 = arith.constant 0 : index
    %4 = vector.load %arg3[%c0_2, %c0_3] : memref<16x64xbf16, #tpu.memory_space<vmem>>, vector<16x64xbf16>
    %c0_4 = arith.constant 0 : index
    %c0_5 = arith.constant 0 : index
    %5 = vector.load %arg4[%c0_4, %c0_5] : memref<64x128xbf16, #tpu.memory_space<vmem>>, vector<64x128xbf16>
    %cst = arith.constant dense<0.000000e+00> : vector<16x128xf32>
    %6 = tpu.matmul %4, %5, %cst {dimension_numbers = #tpu.dot_dimension_numbers<[1], [0], [0], [1], [0, 0, 1, 1], [], []>} : vector<16x64xbf16>, vector<64x128xbf16>, vector<16x128xf32> -> vector<16x128xf32>
    %7 = arith.addf %3, %6 : vector<16x128xf32>
    %c0_6 = arith.constant 0 : index
    %c0_7 = arith.constant 0 : index
    %8 = vector.load %arg7[%c0_6, %c0_7] : memref<16x128xf32, #tpu.memory_space<vmem>>, vector<16x128xf32>
    tpu.vector_store %arg7[%c0_6, %c0_7], %7 {strides = array<i32>} : memref<16x128xf32, #tpu.memory_space<vmem>>, vector<16x128xf32>,
    %c0_i32_8 = arith.constant 0 : i32
    %9 = arith.cmpi eq, %arg2, %c0_i32_8 : i32
    %10 = arith.extui %9 : i1 to i32
    %c0_i32_9 = arith.constant 0 : i32
    %11 = arith.cmpi ne, %10, %c0_i32_9 : i32
    scf.if %11 {
      %c0_10 = arith.constant 0 : index
      %c0_11 = arith.constant 0 : index
      %12 = vector.load %arg7[%c0_10, %c0_11] : memref<16x128xf32, #tpu.memory_space<vmem>>, vector<16x128xf32>
      %c0_12 = arith.constant 0 : index
      %c0_13 = arith.constant 0 : index
      %13 = vector.load %arg5[%c0_12, %c0_13] : memref<1x128xf32, #tpu.memory_space<vmem>>, vector<1x128xf32>
      %14 = vector.broadcast %13 : vector<1x128xf32> to vector<16x128xf32>
      %15 = arith.addf %12, %14 : vector<16x128xf32>
      %c0_14 = arith.constant 0 : index
      %c0_15 = arith.constant 0 : index
      %16 = vector.load %arg6[%c0_14, %c0_15] : memref<16x128xf32, #tpu.memory_space<vmem>>, vector<16x128xf32>
      tpu.vector_store %arg6[%c0_14, %c0_15], %15 {strides = array<i32>} : memref<16x128xf32, #tpu.memory_space<vmem>>, vector<16x128xf32>,
    } else {
    }
    return
  }
  func.func @transform_0(%arg0: i32, %arg1: i32, %arg2: i32) -> (i32, i32) {
    %c0_i32 = arith.constant 0 : i32
    return %arg0, %arg2 : i32, i32
  }
  func.func @transform_1(%arg0: i32, %arg1: i32, %arg2: i32) -> (i32, i32) {
    %c0_i32 = arith.constant 0 : i32
    return %arg2, %arg1 : i32, i32
  }
  func.func @transform_2(%arg0: i32, %arg1: i32, %arg2: i32) -> (i32, i32) {
    %c0_i32 = arith.constant 0 : i32
    %c0_i32_0 = arith.constant 0 : i32
    return %c0_i32, %arg1 : i32, i32
  }
  func.func @transform_3(%arg0: i32, %arg1: i32, %arg2: i32) -> (i32, i32) {
    %c0_i32 = arith.constant 0 : i32
    return %arg0, %arg1 : i32, i32
  }
}

</mosaic_0001>

<bundles_post_ra>
// kernel: _lambda_.28
= control target key start
LH: loop header
LB: loop body
LE: loop exit
PB: predicated region body
PF: predicated region fallthrough
CT: control target
= control target key end

     0   :  { %vm23_vm0 = vcmask 261120   ;;  %s136_s0 = inlined_call_operand.vmem [shape: f32[16,32], index: 0, kind: input, shape index: {}]   ;;  %s137_s1 = inlined_call_operand.vmem [shape: f32[16,32], index: 1, kind: input, shape index: {}]   ;;  %s138_s2 = inlined_call_operand.vmem [shape: f32[1,32], index: 2, kind: input, shape index: {}]   ;;  %s139_s3 = inlined_call_operand.vmem [shape: f32[1,32], index: 3, kind: input, shape index: {}]   ;;  %s140_s4 = inlined_call_operand.vmem [shape: f32[16,32], index: 4, kind: output, shape index: {}]  }
   0x1   :  { %v17_v0 = vld [vmem:[%s136_s0] sm:$0xff]  ;;  %v18_v2 = vld [vmem:[%s136_s0 + $0x8] sm:$0xff] }
   0x2   :  { %v19_v1 = vld [vmem:[%s137_s1] sm:$0xff]  ;;  %v20_v4 = vld [vmem:[%s137_s1 + $0x8] sm:$0xff] }
   0x3   :  { %v21_v3 = vadd.f32 %v19_v1, %v17_v0  ;;  %v22_v5 = vadd.f32 %v20_v4, %v18_v2  ;;  %v75_v25 = vld [vmem:[%s138_s2] ss:$0 sm:$0xff] }
   0x4   :  { %v76_v27 = vld [vmem:[%s139_s3] ss:$0 sm:$0xff] }
   0x5   :  { %v24_v6 = vsel %vm23_vm0, %v21_v3, 0.0  ;;  %v27_v7 = vsel %vm23_vm0, %v22_v5, 0.0 }
   0x6   :  { %25 = vadd.xlane.f32.xlu0 %v24_v6 }
   0xa   :  { %28 = vadd.xlane.f32.xlu0 %v27_v7 }
  0x8f   :  { %v26_v8 = vpop.xlane.xlu0 %25 }
  0x90   :  { %v31_v9 = vmul.f32 0.03125, %v26_v8 }
  0x92   :  { %v33_v10 = vsub.f32 %v21_v3, %v31_v9 }
  0x93   :  { %v29_v11 = vpop.xlane.xlu0 %28 }
  0x94   :  { %v32_v12 = vmul.f32 0.03125, %v29_v11  ;;  %v35_v13 = vmul.f32 %v33_v10, %v33_v10 }
  0x96   :  { %v34_v14 = vsub.f32 %v22_v5, %v32_v12  ;;  %v37_v15 = vsel %vm23_vm0, %v35_v13, 0.0 }
  0x97   :  { %38 = vadd.xlane.f32.xlu1 %v37_v15 }
  0x98   :  { %v36_v16 = vmul.f32 %v34_v14, %v34_v14 }
  0x9a   :  { %v40_v17 = vsel %vm23_vm0, %v36_v16, 0.0 }
  0x9b   :  { %41 = vadd.xlane.f32.xlu1 %v40_v17 }
 0x120   :  { %v39_v18 = vpop.xlane.xlu1 %38 }
 0x121   :  { %v43_v19 = vmul.f32 0.03125, %v39_v18 }
 0x123   :  { %v45_v20 = vadd.f32 1e-05, %v43_v19 }
 0x124   :  { %v42_v21 = vpop.xlane.xlu1 %41 }
 0x125   :  { %77 = vrsqrt.f32 %v45_v20  ;;  %v44_v22 = vmul.f32 0.03125, %v42_v21 }
 0x127   :  { %v46_v23 = vadd.f32 1e-05, %v44_v22 }
 0x129   :  { %79 = vrsqrt.f32 %v46_v23 }
 0x132   :  { %v78_v24 = vpop.eup %77 }
 0x133   :  { %v49_v26 = vmul.f32 %v78_v24, %v33_v10 }
 0x135   :  { %v58_v28 = vmul.f32 %v75_v25, %v49_v26 }
 0x136   :  { %v80_v29 = vpop.eup %79 }
 0x137   :  { %v67_v30 = vadd.f32 %v76_v27, %v58_v28  ;;  %v50_v31 = vmul.f32 %v80_v29, %v34_v14 }
 0x139   :  { %69 = vst.msk [vmem:[%s140_s4] sm:$0xff] %vm23_vm0, %v67_v30  ;;  %v59_v32 = vmul.f32 %v75_v25, %v50_v31 }
 0x13b   :  { %v68_v33 = vadd.f32 %v76_v27, %v59_v32 }
 0x13d   :  { %70 = vst.msk [vmem:[%s140_s4 + $0x8] sm:$0xff] %vm23_vm0, %v68_v33 }

// kernel: _lambda_.25
= control target key start
LH: loop header
LB: loop body
LE: loop exit
PB: predicated region body
PF: predicated region fallthrough
CT: control target
= control target key end

     0   :  { %v153_v0 = vmov 0.0   ;;  %vm154_vm0 = vmmov 0   ;;  %vm46_vm1 = vcmask 261120   ;;  %s190_s1 = inlined_call_operand.vmem [shape: bf16[32,128], index: 1, kind: input, shape index: {}]   ;;  %s191_s0 = inlined_call_operand.vmem [shape: bf16[16,32], index: 0, kind: input, shape index: {}]   ;;  %s192_s2 = inlined_call_operand.vmem [shape: f32[1,128], index: 2, kind: input, shape index: {}]   ;;  %s193_s3 = inlined_call_operand.vmem [shape: bf16[16,128], index: 3, kind: output, shape index: {}]  }
   0x1   :  { %140 = vmatprep.subr.bf16.mxu0 %v153_v0  ;;  %v150_v1 = vld [vmem:[%s190_s1 + $0x8] sm:$0xff]   ;;  %144 = vmatprep.mubr.msk.bf16.mxu0 %vm154_vm0, %v153_v0  ;;  %v151_v2 = vld [vmem:[%s190_s1] sm:$0xff]  }
   0x2   :  { %141 = vmatpush3.bf16.msra.mxu0 %v150_v1  ;;  %v152_v3 = vld [vmem:[%s191_s0] sm:$0xff]  }
   0x3   :  { %142 = vmatprep.subr.bf16.mxu0 %v153_v0  ;;  %v127_v5 = vld [vmem:[%s192_s2] ss:$0 sm:$0xff] }
   0x6   :  { %143 = vmatpush3.bf16.msra.mxu0 %v151_v2 }
   0x9   :  { %145 = vmatmul.mubr.msk.bf16.vlgmr.msra.gmra.mxu0 %vm46_vm1, %v152_v3 }
  0xc9   :  { %v84_v4 = vpop.f32.mrf.mxu0 }
  0xca   :  { %v107_v8 = vadd.f32 %v127_v5, %v84_v4 }
  0xcb   :  { %v146_v6 = vpop.f32.mrf.mxu0 }
  0xcd   :  { %v87_v7 = vpop.f32.mrf.mxu0 }
  0xce   :  { %v108_v9 = vadd.f32 %v127_v5, %v87_v7 }
  0xcf   :  { %v147_v10 = vpop.f32.mrf.mxu0 }
  0xd0   :  { %v135_v11 = vpack.c.bf16 %v108_v9, %v107_v8 }
  0xd2   :  { %136 = vst [vmem:[%s193_s3] sm:$0xff] %v135_v11  }

// kernel: _lambda_.26
= control target key start
LH: loop header
LB: loop body
LE: loop exit
PB: predicated region body
PF: predicated region fallthrough
CT: control target
= control target key end

     0   :  { %s801_s6 = smov 0   ;;  %s897_s0 = inlined_call_operand.vmem [shape: bf16[2,8,96], index: 0, kind: input, shape index: {}]   ;;  %s898_s1 = inlined_call_operand.vmem [shape: bf16[2,8,32], index: 1, kind: output, shape index: {}]  }
   0x1 LB: > { %s644_s7 = sadd.s32 4294967295, %s773_s6   ;;  %p648_p0 = scmp.ge.s32.totalorder %s773_s6, 1  ;;  %s773_s6 = sphi %s801_s6, %s11_s6  }
   0x2   : > { %p86_p1 = scmp.lt.s32.totalorder %s773_s6, 3 }
   0x4   : > { %p87_p2 = pnand %p648_p0, %p86_p1 }
   0x5   : > { %p104_p3 = scmp.lt.s32.totalorder (!%p87_p2), %s644_s7, 1  ;;  %s777_s12 = smov (!%p87_p2), 96  }
   0x6   : > { %90 = sbr.rel (%p87_p2) target bundleno = 1543 (0x607), region = 24  ;;  %s778_s13 = smov (!%p87_p2), 64  }
   0x7   : > { %s779_s14 = smov (!%p87_p2), 88   ;;  %s780_s15 = smov (!%p87_p2), 72  }
   0x8   : > { %s781_s16 = smov (!%p87_p2), 120   ;;  %s782_s17 = smov (!%p87_p2), 80  }
   0x9   : > { %s783_s18 = smov (!%p87_p2), 112   ;;  %s784_s19 = smov (!%p87_p2), 104  }
   0xa   : > { %s785_s20 = smov (!%p87_p2), 56   ;;  %s786_s21 = smov (!%p87_p2), 48  }
   0xb   : > { %v775_v0 = vmov 0.0   ;;  %vm776_vm0 = vmmov 0   ;;  %s900_s7 = smov (!%p104_p3, %s644_s7), 1  ;;  %vm125_vm1 = vcmask 64512   ;;  %v114_v5 = vlaneseq  ;;  %s787_s22 = smov 40  }
   0xc   : > { %678 = vmatprep.subr.bf16.mxu0 %v775_v0  ;;  %680 = vmatprep.mubr.msk.bf16.mxu0 %vm776_vm0, %v775_v0  ;;  %s649_s8 = sshll.u32 %s900_s7, 2  ;;  %vm191_vm3 = vcmask 1043456   ;;  %s788_s23 = smov 8   ;;  %vm584_vm4 = vcmask 130048   ;;  %vm586_vm5 = vcmask 195584   ;;  %vm589_vm6 = vcmask 257024  }
   0xd   : > { %684 = vmatprep.subr.bf16.mxu1 %v775_v0  ;;  %686 = vmatprep.mubr.msk.bf16.mxu1 %vm776_vm0, %v775_v0  ;;  %s107_s11 = scalar_lea.vmem %s897_s0, %s649_s8  ;;  %v115_v6 = vshrl.u32 %v114_v5, 7  ;;  %v117_v7 = vand.u32 127, %v114_v5  ;;  %s789_s24 = smov 16  }
   0xe   : > { %v113_v1 = vld [vmem:[%s107_s11] sm:$0xf]  ;;  %s790_s25 = smov 24   ;;  %s111_s28 = scalar_lea.vmem %s898_s1, %s649_s8 }
   0xf   : > { %v823_v2 = vcombine.low %v113_v1, %v113_v1  ;;  %vm118_vm2 = vcmp.gt.s32.totalorder %v117_v7, %v115_v6 }
  0x10   : > { %v834_v9 = vsel %vm118_vm2, -1e+30, %v775_v0 }
  0x11   : > { %123 = vrot.lane.b32.xlu0 %v823_v2, %s777_s12  ;;  %186 = vrot.lane.b32.xlu1 %v823_v2, %s778_s13 }
  0x15   : > { %237 = vrot.lane.b32.xlu1 %v823_v2, %s779_s14 }
  0x83   : > { %v124_v3 = vpop.permute.xlu0 %123  ;;  %v187_v16 = vpop.permute.xlu1 %186 }
  0x84   : > { %v130_v4 = vsel %vm125_vm1, %v124_v3, 0  ;;  %v193_v17 = vsel %vm191_vm3, %v187_v16, 0 }
  0x85   : > { %679 = vmatpush3.bf16.xpose.msra.mxu0 %v130_v4  ;;  %685 = vmatpush3.bf16.msra.mxu1 %v193_v17 }
  0x86   : > { %696 = vmatprep.subr.bf16.mxu0 %v775_v0  ;;  %690 = vmatprep.subr.bf16.mxu1 %v775_v0 }
  0x87   : > { %v238_v23 = vpop.permute.xlu1 %237 }
  0x88   : > { %v243_v29 = vsel %vm125_vm1, %v238_v23, 0 }
  0x8c   : > { %681 = vmatmul.mubr.msk.bf16.vlgmr.msra.gmra.mxu0 %vm125_vm1, %v113_v1 }
  0x8d   : > { %698 = vmatprep.mubr.msk.bf16.mxu0 %vm776_vm0, %v775_v0 }
 0x14c   : > { %v166_v8 = vpop.f32.mrf.mxu0 }
 0x14d   : > { %v172_v10 = vmul.f32 0.35355338, %v166_v8 }
 0x14e   : > { %v682_v11 = vpop.f32.mrf.mxu0 }
 0x14f   : > { %v173_v12 = vadd.f32 %v172_v10, %v834_v9 }
 0x150   : > { %v169_v13 = vpop.f32.mrf.mxu0 }
 0x151   : > { %v174_v14 = vsel %vm125_vm1, %v173_v12, -inf }
 0x152   : > { %175 = vmax.xlane.f32.xlu0 %v174_v14  ;;  %v683_v15 = vpop.f32.mrf.mxu0 }
 0x168   : > { %461 = vrot.lane.b32.xlu0 %v823_v2, %s780_s15 }
 0x1db   : > { %v176_v18 = vpop.xlane.xlu0 %175 }
 0x1dc   : > { %v177_v19 = vsub.f32 %v173_v12, %v176_v18 }
 0x1de   : > { %v178_v20 = vmul.f32 1.442695, %v177_v19 }
 0x1df   : > { %v462_v32 = vpop.permute.xlu0 %461 }
 0x1e0   : > { %751 = vpow2.f32 %v178_v20  ;;  %v467_v34 = vsel %vm125_vm1, %v462_v32, 0 }
 0x1ed   : > { %v752_v21 = vpop.eup %751 }
 0x1ee   : > { %v180_v22 = vsel %vm125_vm1, %v752_v21, 0.0 }
 0x1ef   : > { %181 = vadd.xlane.f32.xlu1 %v180_v22 }
 0x200   : > { %235 = vrot.lane.b32.xlu1 %v823_v2, %s781_s16 }
 0x204   : > { %349 = vrot.lane.b32.xlu1 %v823_v2, %s782_s17 }
 0x208   : > { %347 = vrot.lane.b32.xlu1 %v823_v2, %s783_s18 }
 0x20c   : > { %459 = vrot.lane.b32.xlu1 %v823_v2, %s784_s19 }
 0x278   : > { %v182_v24 = vpop.xlane.xlu1 %181 }
 0x279   : > { %753 = vrcp.f32 %v182_v24 }
 0x27c   : > { %v236_v27 = vpop.permute.xlu1 %235 }
 0x280   : > { %v350_v30 = vpop.permute.xlu1 %349 }
 0x281   : > { %v355_v31 = vsel %vm125_vm1, %v350_v30, 0 }
 0x284   : > { %v348_v33 = vpop.permute.xlu1 %347 }
 0x286   : > { %v754_v25 = vpop.eup %753 }
 0x287   : > { %v184_v26 = vmul.f32 %v754_v25, %v752_v21 }
 0x288   : > { %v460_v35 = vpop.permute.xlu1 %459 }
 0x289   : > { %v185_v28 = vpack.c.bf16 %v184_v26, %v184_v26 }
 0x28b   : > { %687 = vmatmul.mubr.msk.bf16.vlgmr.msra.gmra.mxu1 %vm125_vm1, %v185_v28 }
 0x28c   : > { %691 = vmatpush3.bf16.xpose.msra.mxu1 %v243_v29  ;;  %692 = vmatprep.mubr.msk.bf16.mxu1 %vm776_vm0, %v775_v0 }
 0x28d   : > { %702 = vmatprep.subr.bf16.mxu1 %v775_v0 }
 0x293   : > { %693 = vmatmul.mubr.msk.bf16.vlgmr.msra.gmra.mxu1 %vm125_vm1, %v236_v27 }
 0x294   : > { %703 = vmatpush3.bf16.xpose.msra.mxu1 %v355_v31  ;;  %704 = vmatprep.mubr.msk.bf16.mxu1 %vm776_vm0, %v775_v0 }
 0x295   : > { %714 = vmatprep.subr.bf16.mxu1 %v775_v0 }
 0x29b   : > { %705 = vmatmul.mubr.msk.bf16.vlgmr.msra.gmra.mxu1 %vm125_vm1, %v348_v33 }
 0x29c   : > { %715 = vmatpush3.bf16.xpose.msra.mxu1 %v467_v34  ;;  %716 = vmatprep.mubr.msk.bf16.mxu1 %vm776_vm0, %v775_v0 }
 0x2a3   : > { %717 = vmatmul.mubr.msk.bf16.vlgmr.msra.gmra.mxu1 %vm125_vm1, %v460_v35 }
 0x34b   : > { %v861_v36 = vpop.f32.mrf.mxu1 }
 0x34d   : > { %v688_v37 = vpop.f32.mrf.mxu1 }
 0x34f   : > { %v232_v38 = vpop.f32.mrf.mxu1 }
 0x351   : > { %v689_v39 = vpop.f32.mrf.mxu1 }
 0x353   : > { %v279_v40 = vpop.f32.mrf.mxu1 }
 0x354   : > { %v285_v41 = vmul.f32 0.35355338, %v279_v40 }
 0x355   : > { %v694_v42 = vpop.f32.mrf.mxu1 }
 0x356   : > { %v286_v43 = vadd.f32 %v285_v41, %v834_v9 }
 0x357   : > { %v282_v44 = vpop.f32.mrf.mxu1 }
 0x358   : > { %v287_v45 = vsel %vm125_vm1, %v286_v43, -inf }
 0x359   : > { %288 = vmax.xlane.f32.xlu1 %v287_v45  ;;  %v695_v46 = vpop.f32.mrf.mxu1 }
 0x35b   : > { %v391_v47 = vpop.f32.mrf.mxu1 }
 0x35c   : > { %v397_v48 = vmul.f32 0.35355338, %v391_v47 }
 0x35d   : > { %v706_v49 = vpop.f32.mrf.mxu1 }
 0x35e   : > { %v398_v50 = vadd.f32 %v397_v48, %v834_v9 }
 0x35f   : > { %v394_v51 = vpop.f32.mrf.mxu1 }
 0x360   : > { %v399_v52 = vsel %vm125_vm1, %v398_v50, -inf }
 0x361   : > { %400 = vmax.xlane.f32.xlu0 %v399_v52  ;;  %v707_v53 = vpop.f32.mrf.mxu1 }
 0x363   : > { %v503_v54 = vpop.f32.mrf.mxu1 }
 0x364   : > { %v509_v55 = vmul.f32 0.35355338, %v503_v54 }
 0x365   : > { %v718_v56 = vpop.f32.mrf.mxu1 }
 0x366   : > { %v510_v57 = vadd.f32 %v509_v55, %v834_v9 }
 0x367   : > { %v506_v58 = vpop.f32.mrf.mxu1 }
 0x368   : > { %v511_v59 = vsel %vm125_vm1, %v510_v57, -inf }
 0x369   : > { %512 = vmax.xlane.f32.xlu1 %v511_v59  ;;  %v719_v60 = vpop.f32.mrf.mxu1 }
 0x3e2   : > { %v289_v61 = vpop.xlane.xlu1 %288 }
 0x3e3   : > { %v290_v62 = vsub.f32 %v286_v43, %v289_v61 }
 0x3e5   : > { %v291_v63 = vmul.f32 1.442695, %v290_v62 }
 0x3e7   : > { %755 = vpow2.f32 %v291_v63 }
 0x3ea   : > { %v401_v9 = vpop.xlane.xlu0 %400 }
 0x3eb   : > { %v402_v10 = vsub.f32 %v398_v50, %v401_v9 }
 0x3ed   : > { %v403_v11 = vmul.f32 1.442695, %v402_v10 }
 0x3f2   : > { %v513_v1 = vpop.xlane.xlu1 %512 }
 0x3f3   : > { %v514_v3 = vsub.f32 %v510_v57, %v513_v1 }
 0x3f4   : > { %v756_v4 = vpop.eup %755 }
 0x3f5   : > { %v515_v5 = vmul.f32 1.442695, %v514_v3  ;;  %v293_v6 = vsel %vm125_vm1, %v756_v4, 0.0 }
 0x3f6   : > { %294 = vadd.xlane.f32.xlu1 %v293_v6 }
 0x3f7   : > { %757 = vpow2.f32 %v515_v5 }
 0x3f8   : > { %759 = vpow2.f32 %v403_v11 }
 0x404   : > { %v758_v7 = vpop.eup %757 }
 0x405   : > { %v517_v8 = vsel %vm125_vm1, %v758_v7, 0.0  ;;  %v760_v12 = vpop.eup %759 }
 0x406   : > { %518 = vadd.xlane.f32.xlu0 %v517_v8  ;;  %v405_v13 = vsel %vm125_vm1, %v760_v12, 0.0 }
 0x407   : > { %299 = vrot.lane.b32.xlu1 %v823_v2, %s785_s20 }
 0x41c   : > { %411 = vrot.lane.b32.xlu0 %v823_v2, %s786_s21 }
 0x42b   : > { %406 = vadd.xlane.f32.xlu1 %v405_v13 }
 0x43c   : > { %523 = vrot.lane.b32.xlu1 %v823_v2, %s787_s22 }
 0x47f   : > { %v295_v14 = vpop.xlane.xlu1 %294 }
 0x480   : > { %761 = vrcp.f32 %v295_v14 }
 0x483   : > { %v300_v15 = vpop.permute.xlu1 %299 }
 0x484   : > { %v305_v16 = vsel %vm191_vm3, %v300_v15, 0 }
 0x485   : > { %697 = vmatpush3.bf16.msra.mxu0 %v305_v16 }
 0x486   : > { %708 = vmatprep.subr.bf16.mxu0 %v775_v0 }
 0x48d   : > { %v762_v17 = vpop.eup %761 }
 0x48e   : > { %v297_v18 = vmul.f32 %v762_v17, %v756_v4 }
 0x48f   : > { %v519_v19 = vpop.xlane.xlu0 %518 }
 0x490   : > { %v298_v20 = vpack.c.bf16 %v297_v18, %v297_v18 }
 0x492   : > { %699 = vmatmul.mubr.msk.bf16.vlgmr.msra.gmra.mxu0 %vm125_vm1, %v298_v20 }
 0x493   : > { %v412_v21 = vpop.permute.xlu0 %411  ;;  %710 = vmatprep.mubr.msk.bf16.mxu0 %vm776_vm0, %v775_v0 }
 0x494   : > { %v417_v2 = vsel %vm191_vm3, %v412_v21, 0 }
 0x495   : > { %709 = vmatpush3.bf16.msra.mxu0 %v417_v2 }
 0x496   : > { %720 = vmatprep.subr.bf16.mxu0 %v775_v0 }
 0x4b4   : > { %v407_v22 = vpop.xlane.xlu1 %406 }
 0x4b5   : > { %763 = vrcp.f32 %v407_v22 }
 0x4b6   : > { %765 = vrcp.f32 %v519_v19 }
 0x4b8   : > { %v524_v24 = vpop.permute.xlu1 %523 }
 0x4b9   : > { %v529_v26 = vsel %vm191_vm3, %v524_v24, 0 }
 0x4c2   : > { %v764_v23 = vpop.eup %763 }
 0x4c3   : > { %v409_v25 = vmul.f32 %v764_v23, %v760_v12  ;;  %v766_v28 = vpop.eup %765 }
 0x4c4   : > { %v521_v29 = vmul.f32 %v766_v28, %v758_v7 }
 0x4c5   : > { %v410_v27 = vpack.c.bf16 %v409_v25, %v409_v25 }
 0x4c6   : > { %v522_v30 = vpack.c.bf16 %v521_v29, %v521_v29 }
 0x4c7   : > { %711 = vmatmul.mubr.msk.bf16.vlgmr.msra.gmra.mxu0 %vm125_vm1, %v410_v27 }
 0x4c8   : > { %721 = vmatpush3.bf16.msra.mxu0 %v529_v26  ;;  %722 = vmatprep.mubr.msk.bf16.mxu0 %vm776_vm0, %v775_v0 }
 0x4cf   : > { %723 = vmatmul.mubr.msk.bf16.vlgmr.msra.gmra.mxu0 %vm125_vm1, %v522_v30 }
 0x552   : > { %v341_v31 = vpop.f32.mrf.mxu0 }
 0x553   : > { %572 = vrot.lane.b32.xlu1 %v341_v31, %s788_s23 }
 0x554   : > { %v700_v32 = vpop.f32.mrf.mxu0 }
 0x556   : > { %v344_v33 = vpop.f32.mrf.mxu0 }
 0x558   : > { %v701_v34 = vpop.f32.mrf.mxu0 }
 0x587   : > { %v453_v35 = vpop.f32.mrf.mxu0 }
 0x588   : > { %576 = vrot.lane.b32.xlu0 %v453_v35, %s789_s24 }
 0x589   : > { %v712_v37 = vpop.f32.mrf.mxu0 }
 0x58b   : > { %v456_v38 = vpop.f32.mrf.mxu0 }
 0x58d   : > { %v713_v39 = vpop.f32.mrf.mxu0 }
 0x58f   : > { %v565_v40 = vpop.f32.mrf.mxu0 }
 0x590   : > { %580 = vrot.lane.b32.xlu1 %v565_v40, %s790_s25 }
 0x591   : > { %v724_v0 = vpop.f32.mrf.mxu0 }
 0x593   : > { %v568_v41 = vpop.f32.mrf.mxu0 }
 0x595   : > { %v725_v42 = vpop.f32.mrf.mxu0 }
 0x5c5   : > { %v573_v43 = vpop.permute.xlu1 %572 }
 0x5c6   : > { %v583_v45 = vsel %vm125_vm1, %v861_v36, %v573_v43 }
 0x5fa   : > { %v577_v44 = vpop.permute.xlu0 %576 }
 0x5fb   : > { %v585_v46 = vsel %vm584_vm4, %v583_v45, %v577_v44 }
 0x602   : > { %v581_v47 = vpop.permute.xlu1 %580 }
 0x603   : > { %v587_v48 = vsel %vm586_vm5, %v585_v46, %v581_v47 }
 0x604   : > { %v588_v49 = vpack.c.bf16 %v587_v48, %v587_v48 }
 0x606   : > { %590 = vst.msk [vmem:[%s111_s28] sm:$0xf] %vm589_vm6, %v588_v49 }
 0x607 PF: > { %s11_s6 = sadd.s32 1, %s773_s6  }
 0x608   : > { %p8_p4 = scmp.ge.s32.totalorder %s11_s6, 4  }
 0x60a   :  { %10 = sbr.rel (!%p8_p4) target bundleno = 1 (0x1), region = 54 }

// kernel: _lambda_.27
= control target key start
LH: loop header
LB: loop body
LE: loop exit
PB: predicated region body
PF: predicated region fallthrough
CT: control target
= control target key end

     0   :  { %v136_v0 = vmov 0.0   ;;  %vm137_vm0 = vmmov 0   ;;  %vm46_vm1 = vcmask 261120   ;;  %s176_s1 = inlined_call_operand.vmem [shape: bf16[32,128], index: 1, kind: input, shape index: {}]   ;;  %s177_s0 = inlined_call_operand.vmem [shape: bf16[16,32], index: 0, kind: input, shape index: {}]   ;;  %s178_s2 = inlined_call_operand.vmem [shape: f32[1,128], index: 2, kind: input, shape index: {}]   ;;  %s179_s3 = inlined_call_operand.vmem [shape: f32[16,128], index: 3, kind: output, shape index: {}]  }
   0x1   :  { %123 = vmatprep.subr.bf16.mxu0 %v136_v0  ;;  %v133_v1 = vld [vmem:[%s176_s1 + $0x8] sm:$0xff]   ;;  %127 = vmatprep.mubr.msk.bf16.mxu0 %vm137_vm0, %v136_v0  ;;  %v134_v2 = vld [vmem:[%s176_s1] sm:$0xff]  }
   0x2   :  { %124 = vmatpush3.bf16.msra.mxu0 %v133_v1  ;;  %v135_v3 = vld [vmem:[%s177_s0] sm:$0xff]  }
   0x3   :  { %125 = vmatprep.subr.bf16.mxu0 %v136_v0  ;;  %v119_v4 = vld [vmem:[%s178_s2] ss:$0 sm:$0xff] }
   0x6   :  { %126 = vmatpush3.bf16.msra.mxu0 %v134_v2 }
   0x9   :  { %128 = vmatmul.mubr.msk.bf16.vlgmr.msra.gmra.mxu0 %vm46_vm1, %v135_v3 }
  0xc9   :  { %v84_v5 = vpop.f32.mrf.mxu0 }
  0xca   :  { %v107_v6 = vadd.f32 %v119_v4, %v84_v5 }
  0xcb   :  { %v129_v7 = vpop.f32.mrf.mxu0 }
  0xcc   :  { %109 = vst [vmem:[%s179_s3] sm:$0xff] %v107_v6 }
  0xcd   :  { %v87_v8 = vpop.f32.mrf.mxu0 }
  0xce   :  { %v108_v9 = vadd.f32 %v119_v4, %v87_v8 }
  0xcf   :  { %v130_v10 = vpop.f32.mrf.mxu0 }
  0xd0   :  { %110 = vst [vmem:[%s179_s3 + $0x8] sm:$0xff] %v108_v9 }

// kernel: _lambda_.34
= control target key start
LH: loop header
LB: loop body
LE: loop exit
PB: predicated region body
PF: predicated region fallthrough
CT: control target
= control target key end

     0   :  { %v155_v0 = vmov 0.0   ;;  %vm156_vm0 = vmmov 0   ;;  %vm46_vm1 = vcmask 261120   ;;  %s192_s1 = inlined_call_operand.vmem [shape: bf16[32,128], index: 1, kind: input, shape index: {}]   ;;  %s193_s0 = inlined_call_operand.vmem [shape: bf16[16,32], index: 0, kind: input, shape index: {}]   ;;  %s194_s2 = inlined_call_operand.vmem [shape: f32[1,128], index: 2, kind: input, shape index: {}]   ;;  %s195_s3 = inlined_call_operand.vmem [shape: bf16[16,128], index: 3, kind: output, shape index: {}]  }
   0x1   :  { %142 = vmatprep.subr.bf16.mxu0 %v155_v0  ;;  %v152_v1 = vld [vmem:[%s192_s1 + $0x8] sm:$0xff]   ;;  %146 = vmatprep.mubr.msk.bf16.mxu0 %vm156_vm0, %v155_v0  ;;  %v153_v2 = vld [vmem:[%s192_s1] sm:$0xff]  }
   0x2   :  { %143 = vmatpush3.bf16.msra.mxu0 %v152_v1  ;;  %v154_v3 = vld [vmem:[%s193_s0] sm:$0xff]  }
   0x3   :  { %144 = vmatprep.subr.bf16.mxu0 %v155_v0  ;;  %v129_v5 = vld [vmem:[%s194_s2] ss:$0 sm:$0xff] }
   0x6   :  { %145 = vmatpush3.bf16.msra.mxu0 %v153_v2 }
   0x9   :  { %147 = vmatmul.mubr.msk.bf16.vlgmr.msra.gmra.mxu0 %vm46_vm1, %v154_v3 }
  0xc9   :  { %v84_v4 = vpop.f32.mrf.mxu0 }
  0xca   :  { %v107_v7 = vadd.f32 %v129_v5, %v84_v4 }
  0xcb   :  { %v148_v6 = vpop.f32.mrf.mxu0 }
  0xcc   :  { %v109_v11 = vmax.f32 %v107_v7, 0.0 }
  0xcd   :  { %v87_v8 = vpop.f32.mrf.mxu0 }
  0xce   :  { %v108_v9 = vadd.f32 %v129_v5, %v87_v8 }
  0xcf   :  { %v149_v10 = vpop.f32.mrf.mxu0 }
  0xd0   :  { %v110_v12 = vmax.f32 %v108_v9, 0.0 }
  0xd2   :  { %v137_v13 = vpack.c.bf16 %v110_v12, %v109_v11 }
  0xd4   :  { %138 = vst [vmem:[%s195_s3] sm:$0xff] %v137_v13  }

// kernel: _lambda_.31
= control target key start
LH: loop header
LB: loop body
LE: loop exit
PB: predicated region body
PF: predicated region fallthrough
CT: control target
= control target key end

     0   :  { %s849_s9 = smov 0   ;;  %s935_s0 = inlined_call_operand.vmem [shape: bf16[2,8,32], index: 0, kind: input, shape index: {}]   ;;  %s936_s1 = inlined_call_operand.vmem [shape: bf16[2,8,64], index: 1, kind: input, shape index: {}]   ;;  %s937_s2 = inlined_call_operand.vmem [shape: bf16[2,8,32], index: 2, kind: output, shape index: {}]  }
   0x1 LB: > { %s692_s10 = sadd.s32 4294967295, %s820_s9   ;;  %p696_p0 = scmp.ge.s32.totalorder %s820_s9, 1  ;;  %s820_s9 = sphi %s849_s9, %s12_s9  }
   0x2   : > { %p120_p1 = scmp.lt.s32.totalorder %s820_s9, 3 }
   0x4   : > { %p121_p2 = pnand %p696_p0, %p120_p1 }
   0x5   : > { %p144_p3 = scmp.lt.s32.totalorder (!%p121_p2), %s692_s10, 1  ;;  %s824_s18 = smov (!%p121_p2), 96  }
   0x6   : > { %124 = sbr.rel (%p121_p2) target bundleno = 1377 (0x561), region = 28  ;;  %s825_s19 = smov (!%p121_p2), 120  }
   0x7   : > { %s826_s20 = smov (!%p121_p2), 112   ;;  %s827_s21 = smov (!%p121_p2), 104  }
   0x8   : > { %s828_s22 = smov (!%p121_p2), 88   ;;  %s829_s23 = smov (!%p121_p2), 72  }
   0x9   : > { %s830_s24 = smov (!%p121_p2), 80   ;;  %s831_s25 = smov (!%p121_p2), 8  }
   0xa   : > { %s832_s26 = smov (!%p121_p2), 16   ;;  %s833_s27 = smov (!%p121_p2), 24  }
   0xb   : > { %v822_v0 = vmov 0.0   ;;  %vm823_vm0 = vmmov 0   ;;  %s939_s10 = smov (!%p144_p3, %s692_s10), 1  ;;  %vm159_vm1 = vcmask 64512   ;;  %vm227_vm2 = vcmask 1043456  }
   0xc   : > { %728 = vmatprep.subr.bf16.mxu0 %v822_v0  ;;  %730 = vmatprep.mubr.msk.bf16.mxu0 %vm823_vm0, %v822_v0  ;;  %s863_s11 = sshll.u32 %s939_s10, 2  ;;  %vm620_vm3 = vcmask 130048   ;;  %vm622_vm4 = vcmask 195584   ;;  %vm625_vm5 = vcmask 257024  }
   0xd   : > { %734 = vmatprep.subr.bf16.mxu1 %v822_v0  ;;  %736 = vmatprep.mubr.msk.bf16.mxu1 %vm823_vm0, %v822_v0  ;;  %s151_s14 = scalar_lea.vmem %s936_s1, %s863_s11  ;;  %s147_s17 = scalar_lea.vmem %s935_s0, %s863_s11 }
   0xe   : > { %v157_v1 = vld [vmem:[%s151_s14] sm:$0xf]  ;;  %s155_s30 = scalar_lea.vmem %s937_s2, %s863_s11 }
   0xf   : > { %v164_v2 = vsel %vm159_vm1, %v157_v1, 0  ;;  %v158_v3 = vld [vmem:[%s147_s17] sm:$0xf]  ;;  %v879_v10 = vcombine.low %v157_v1, %v157_v1 }
  0x10   : > { %729 = vmatpush3.bf16.xpose.msra.mxu0 %v164_v2  ;;  %v703_v11 = vcombine.low %v158_v3, %v158_v3 }
  0x11   : > { %746 = vmatprep.subr.bf16.mxu0 %v822_v0  ;;  %222 = vrot.lane.b32.xlu1 %v879_v10, %s824_s18 }
  0x15   : > { %276 = vrot.lane.b32.xlu1 %v879_v10, %s825_s19 }
  0x17   : > { %731 = vmatmul.mubr.msk.bf16.vlgmr.msra.gmra.mxu0 %vm159_vm1, %v158_v3 }
  0x18   : > { %748 = vmatprep.mubr.msk.bf16.mxu0 %vm823_vm0, %v822_v0 }
  0x19   : > { %387 = vrot.lane.b32.xlu1 %v879_v10, %s826_s20 }
  0x1d   : > { %385 = vrot.lane.b32.xlu1 %v703_v11, %s826_s20 }
  0x21   : > { %498 = vrot.lane.b32.xlu1 %v879_v10, %s827_s21 }
  0x25   : > { %496 = vrot.lane.b32.xlu1 %v703_v11, %s827_s21 }
  0x83   : > { %v223_v17 = vpop.permute.xlu1 %222 }
  0x84   : > { %v229_v18 = vsel %vm227_vm2, %v223_v17, 0 }
  0x85   : > { %735 = vmatpush3.bf16.msra.mxu1 %v229_v18 }
  0x86   : > { %740 = vmatprep.subr.bf16.mxu1 %v822_v0 }
  0x87   : > { %v277_v21 = vpop.permute.xlu1 %276 }
  0x88   : > { %v282_v23 = vsel %vm159_vm1, %v277_v21, 0 }
  0x8b   : > { %v388_v25 = vpop.permute.xlu1 %387 }
  0x8c   : > { %v393_v28 = vsel %vm159_vm1, %v388_v25, 0 }
  0x8f   : > { %v386_v27 = vpop.permute.xlu1 %385 }
  0x93   : > { %v499_v29 = vpop.permute.xlu1 %498 }
  0x94   : > { %v504_v30 = vsel %vm159_vm1, %v499_v29, 0 }
  0x97   : > { %v497_v31 = vpop.permute.xlu1 %496 }
  0xd7   : > { %v200_v4 = vpop.f32.mrf.mxu0 }
  0xd8   : > { %v206_v5 = vmul.f32 0.35355338, %v200_v4 }
  0xd9   : > { %v732_v6 = vpop.f32.mrf.mxu0 }
  0xda   : > { %v207_v7 = vsel %vm159_vm1, %v206_v5, -inf }
  0xdb   : > { %208 = vmax.xlane.f32.xlu0 %v207_v7  ;;  %v203_v8 = vpop.f32.mrf.mxu0 }
  0xdd   : > { %v733_v9 = vpop.f32.mrf.mxu0 }
 0x164   : > { %v209_v12 = vpop.xlane.xlu0 %208 }
 0x165   : > { %v210_v13 = vsub.f32 %v206_v5, %v209_v12 }
 0x167   : > { %v211_v14 = vmul.f32 1.442695, %v210_v13 }
 0x169   : > { %798 = vpow2.f32 %v211_v14 }
 0x176   : > { %v799_v15 = vpop.eup %798 }
 0x177   : > { %v213_v16 = vsel %vm159_vm1, %v799_v15, 0.0 }
 0x178   : > { %214 = vadd.xlane.f32.xlu0 %v213_v16 }
 0x18e   : > { %274 = vrot.lane.b32.xlu0 %v703_v11, %s825_s19 }
 0x201   : > { %v215_v19 = vpop.xlane.xlu0 %214 }
 0x202   : > { %800 = vrcp.f32 %v215_v19 }
 0x205   : > { %v275_v26 = vpop.permute.xlu0 %274 }
 0x20f   : > { %v801_v20 = vpop.eup %800 }
 0x210   : > { %v217_v22 = vmul.f32 %v801_v20, %v799_v15 }
 0x212   : > { %v218_v24 = vpack.c.bf16 %v217_v22, %v217_v22 }
 0x214   : > { %737 = vmatmul.mubr.msk.bf16.vlgmr.msra.gmra.mxu1 %vm159_vm1, %v218_v24 }
 0x215   : > { %741 = vmatpush3.bf16.xpose.msra.mxu1 %v282_v23  ;;  %742 = vmatprep.mubr.msk.bf16.mxu1 %vm823_vm0, %v822_v0 }
 0x216   : > { %752 = vmatprep.subr.bf16.mxu1 %v822_v0 }
 0x21c   : > { %743 = vmatmul.mubr.msk.bf16.vlgmr.msra.gmra.mxu1 %vm159_vm1, %v275_v26 }
 0x21d   : > { %753 = vmatpush3.bf16.xpose.msra.mxu1 %v393_v28  ;;  %754 = vmatprep.mubr.msk.bf16.mxu1 %vm823_vm0, %v822_v0 }
 0x21e   : > { %764 = vmatprep.subr.bf16.mxu1 %v822_v0 }
 0x224   : > { %755 = vmatmul.mubr.msk.bf16.vlgmr.msra.gmra.mxu1 %vm159_vm1, %v386_v27 }
 0x225   : > { %765 = vmatpush3.bf16.xpose.msra.mxu1 %v504_v30  ;;  %766 = vmatprep.mubr.msk.bf16.mxu1 %vm823_vm0, %v822_v0 }
 0x22c   : > { %767 = vmatmul.mubr.msk.bf16.vlgmr.msra.gmra.mxu1 %vm159_vm1, %v497_v31 }
 0x2d4   : > { %v903_v32 = vpop.f32.mrf.mxu1 }
 0x2d6   : > { %v738_v33 = vpop.f32.mrf.mxu1 }
 0x2d8   : > { %v268_v34 = vpop.f32.mrf.mxu1 }
 0x2da   : > { %v739_v35 = vpop.f32.mrf.mxu1 }
 0x2dc   : > { %v318_v36 = vpop.f32.mrf.mxu1 }
 0x2dd   : > { %v324_v37 = vmul.f32 0.35355338, %v318_v36 }
 0x2de   : > { %v744_v38 = vpop.f32.mrf.mxu1 }
 0x2df   : > { %v325_v39 = vsel %vm159_vm1, %v324_v37, -inf }
 0x2e0   : > { %326 = vmax.xlane.f32.xlu1 %v325_v39  ;;  %v321_v40 = vpop.f32.mrf.mxu1 }
 0x2e2   : > { %v745_v41 = vpop.f32.mrf.mxu1 }
 0x2e4   : > { %v429_v42 = vpop.f32.mrf.mxu1 }
 0x2e5   : > { %v435_v43 = vmul.f32 0.35355338, %v429_v42 }
 0x2e6   : > { %v756_v44 = vpop.f32.mrf.mxu1 }
 0x2e7   : > { %v436_v45 = vsel %vm159_vm1, %v435_v43, -inf }
 0x2e8   : > { %437 = vmax.xlane.f32.xlu0 %v436_v45  ;;  %v432_v46 = vpop.f32.mrf.mxu1 }
 0x2ea   : > { %v757_v47 = vpop.f32.mrf.mxu1 }
 0x2ec   : > { %v540_v48 = vpop.f32.mrf.mxu1 }
 0x2ed   : > { %v546_v49 = vmul.f32 0.35355338, %v540_v48 }
 0x2ee   : > { %v768_v50 = vpop.f32.mrf.mxu1 }
 0x2ef   : > { %v547_v51 = vsel %vm159_vm1, %v546_v49, -inf }
 0x2f0   : > { %548 = vmax.xlane.f32.xlu1 %v547_v51  ;;  %v543_v52 = vpop.f32.mrf.mxu1 }
 0x2f2   : > { %v769_v53 = vpop.f32.mrf.mxu1 }
 0x301   : > { %337 = vrot.lane.b32.xlu1 %v879_v10, %s828_s22 }
 0x369   : > { %v327_v54 = vpop.xlane.xlu1 %326 }
 0x36a   : > { %v328_v55 = vsub.f32 %v324_v37, %v327_v54 }
 0x36c   : > { %v329_v56 = vmul.f32 1.442695, %v328_v55 }
 0x36e   : > { %802 = vpow2.f32 %v329_v56 }
 0x371   : > { %v438_v57 = vpop.xlane.xlu0 %437 }
 0x372   : > { %v439_v58 = vsub.f32 %v435_v43, %v438_v57 }
 0x374   : > { %v440_v59 = vmul.f32 1.442695, %v439_v58 }
 0x376   : > { %804 = vpow2.f32 %v440_v59 }
 0x379   : > { %v549_v60 = vpop.xlane.xlu1 %548 }
 0x37a   : > { %v550_v61 = vsub.f32 %v546_v49, %v549_v60 }
 0x37b   : > { %v803_v62 = vpop.eup %802 }
 0x37c   : > { %v551_v63 = vmul.f32 1.442695, %v550_v61  ;;  %v331_v1 = vsel %vm159_vm1, %v803_v62, 0.0 }
 0x37d   : > { %332 = vadd.xlane.f32.xlu0 %v331_v1  ;;  %v338_v2 = vpop.permute.xlu1 %337 }
 0x37e   : > { %806 = vpow2.f32 %v551_v63  ;;  %v343_v3 = vsel %vm227_vm2, %v338_v2, 0 }
 0x37f   : > { %747 = vmatpush3.bf16.msra.mxu0 %v343_v3 }
 0x380   : > { %758 = vmatprep.subr.bf16.mxu0 %v822_v0 }
 0x383   : > { %v805_v4 = vpop.eup %804 }
 0x384   : > { %v442_v5 = vsel %vm159_vm1, %v805_v4, 0.0 }
 0x385   : > { %443 = vadd.xlane.f32.xlu1 %v442_v5 }
 0x38b   : > { %v807_v6 = vpop.eup %806 }
 0x38c   : > { %v553_v7 = vsel %vm159_vm1, %v807_v6, 0.0 }
 0x38d   : > { %554 = vadd.xlane.f32.xlu0 %v553_v7 }
 0x396   : > { %559 = vrot.lane.b32.xlu1 %v879_v10, %s829_s23 }
 0x3a3   : > { %448 = vrot.lane.b32.xlu0 %v879_v10, %s830_s24 }
 0x406   : > { %v333_v8 = vpop.xlane.xlu0 %332 }
 0x407   : > { %808 = vrcp.f32 %v333_v8 }
 0x40e   : > { %v444_v9 = vpop.xlane.xlu1 %443 }
 0x40f   : > { %810 = vrcp.f32 %v444_v9 }
 0x412   : > { %v560_v10 = vpop.permute.xlu1 %559 }
 0x413   : > { %v565_v20 = vsel %vm227_vm2, %v560_v10, 0 }
 0x414   : > { %v809_v11 = vpop.eup %808 }
 0x415   : > { %v335_v12 = vmul.f32 %v809_v11, %v803_v62 }
 0x416   : > { %v555_v13 = vpop.xlane.xlu0 %554 }
 0x417   : > { %812 = vrcp.f32 %v555_v13  ;;  %v336_v14 = vpack.c.bf16 %v335_v12, %v335_v12 }
 0x419   : > { %749 = vmatmul.mubr.msk.bf16.vlgmr.msra.gmra.mxu0 %vm159_vm1, %v336_v14 }
 0x41a   : > { %v449_v15 = vpop.permute.xlu0 %448  ;;  %760 = vmatprep.mubr.msk.bf16.mxu0 %vm823_vm0, %v822_v0 }
 0x41b   : > { %v454_v16 = vsel %vm227_vm2, %v449_v15, 0 }
 0x41c   : > { %v811_v17 = vpop.eup %810  ;;  %759 = vmatpush3.bf16.msra.mxu0 %v454_v16 }
 0x41d   : > { %v446_v18 = vmul.f32 %v811_v17, %v805_v4  ;;  %770 = vmatprep.subr.bf16.mxu0 %v822_v0 }
 0x41f   : > { %v447_v19 = vpack.c.bf16 %v446_v18, %v446_v18 }
 0x421   : > { %761 = vmatmul.mubr.msk.bf16.vlgmr.msra.gmra.mxu0 %vm159_vm1, %v447_v19 }
 0x422   : > { %771 = vmatpush3.bf16.msra.mxu0 %v565_v20  ;;  %772 = vmatprep.mubr.msk.bf16.mxu0 %vm823_vm0, %v822_v0 }
 0x424   : > { %v813_v21 = vpop.eup %812 }
 0x425   : > { %v557_v22 = vmul.f32 %v813_v21, %v807_v6 }
 0x427   : > { %v558_v23 = vpack.c.bf16 %v557_v22, %v557_v22 }
 0x429   : > { %773 = vmatmul.mubr.msk.bf16.vlgmr.msra.gmra.mxu0 %vm159_vm1, %v558_v23 }
 0x4d9   : > { %v379_v24 = vpop.f32.mrf.mxu0 }
 0x4da   : > { %608 = vrot.lane.b32.xlu1 %v379_v24, %s831_s25 }
 0x4db   : > { %v750_v25 = vpop.f32.mrf.mxu0 }
 0x4dd   : > { %v382_v26 = vpop.f32.mrf.mxu0 }
 0x4df   : > { %v751_v27 = vpop.f32.mrf.mxu0 }
 0x4e1   : > { %v490_v28 = vpop.f32.mrf.mxu0 }
 0x4e2   : > { %612 = vrot.lane.b32.xlu0 %v490_v28, %s832_s26 }
 0x4e3   : > { %v762_v29 = vpop.f32.mrf.mxu0 }
 0x4e5   : > { %v493_v30 = vpop.f32.mrf.mxu0 }
 0x4e7   : > { %v763_v31 = vpop.f32.mrf.mxu0 }
 0x4e9   : > { %v601_v33 = vpop.f32.mrf.mxu0 }
 0x4ea   : > { %616 = vrot.lane.b32.xlu1 %v601_v33, %s833_s27 }
 0x4eb   : > { %v774_v0 = vpop.f32.mrf.mxu0 }
 0x4ed   : > { %v604_v34 = vpop.f32.mrf.mxu0 }
 0x4ef   : > { %v775_v35 = vpop.f32.mrf.mxu0 }
 0x54c   : > { %v609_v36 = vpop.permute.xlu1 %608 }
 0x54d   : > { %v619_v38 = vsel %vm159_vm1, %v903_v32, %v609_v36 }
 0x554   : > { %v613_v37 = vpop.permute.xlu0 %612 }
 0x555   : > { %v621_v39 = vsel %vm620_vm3, %v619_v38, %v613_v37 }
 0x55c   : > { %v617_v40 = vpop.permute.xlu1 %616 }
 0x55d   : > { %v623_v41 = vsel %vm622_vm4, %v621_v39, %v617_v40 }
 0x55e   : > { %v624_v42 = vpack.c.bf16 %v623_v41, %v623_v41 }
 0x560   : > { %626 = vst.msk [vmem:[%s155_s30] sm:$0xf] %vm625_vm5, %v624_v42 }
 0x561 PF: > { %s12_s9 = sadd.s32 1, %s820_s9  }
 0x562   : > { %p9_p4 = scmp.ge.s32.totalorder %s12_s9, 4  }
 0x564   :  { %11 = sbr.rel (!%p9_p4) target bundleno = 1 (0x1), region = 61 }

// kernel: _lambda_.35
= control target key start
LH: loop header
LB: loop body
LE: loop exit
PB: predicated region body
PF: predicated region fallthrough
CT: control target
= control target key end

     0   :  { %v162_v0 = vmov 0.0   ;;  %vm163_vm0 = vmmov 0   ;;  %vm62_vm1 = vcmask 523264   ;;  %s208_s1 = inlined_call_operand.vmem [shape: bf16[64,128], index: 1, kind: input, shape index: {}]   ;;  %s209_s0 = inlined_call_operand.vmem [shape: bf16[16,64], index: 0, kind: input, shape index: {}]   ;;  %s210_s2 = inlined_call_operand.vmem [shape: f32[1,128], index: 2, kind: input, shape index: {}]   ;;  %s211_s3 = inlined_call_operand.vmem [shape: f32[16,128], index: 3, kind: output, shape index: {}]  }
   0x1   :  { %143 = vmatprep.subr.bf16.mxu0 %v162_v0  ;;  %v157_v1 = vld [vmem:[%s208_s1 + $0x18] sm:$0xff]   ;;  %151 = vmatprep.mubr.msk.bf16.mxu0 %vm163_vm0, %v162_v0  ;;  %v158_v2 = vld [vmem:[%s208_s1 + $0x10] sm:$0xff]   ;;  %v159_v3 = vld [vmem:[%s208_s1 + $0x8] sm:$0xff]  }
   0x2   :  { %144 = vmatpush3.bf16.msra.mxu0 %v157_v1  ;;  %v160_v4 = vld [vmem:[%s208_s1] sm:$0xff]  }
   0x3   :  { %145 = vmatprep.subr.bf16.mxu0 %v162_v0  ;;  %v161_v5 = vld [vmem:[%s209_s0] sm:$0xff]  }
   0x4   :  { %v137_v6 = vld [vmem:[%s210_s2] ss:$0 sm:$0xff] }
   0x6   :  { %146 = vmatpush3.bf16.msra.mxu0 %v158_v2 }
   0x7   :  { %147 = vmatprep.subr.bf16.mxu0 %v162_v0 }
   0xa   :  { %148 = vmatpush3.bf16.msra.mxu0 %v159_v3 }
   0xb   :  { %149 = vmatprep.subr.bf16.mxu0 %v162_v0 }
   0xe   :  { %150 = vmatpush3.bf16.msra.mxu0 %v160_v4 }
  0x11   :  { %152 = vmatmul.mubr.msk.bf16.vlgmr.msra.gmra.mxu0 %vm62_vm1, %v161_v5 }
  0xd1   :  { %v100_v7 = vpop.f32.mrf.mxu0 }
  0xd2   :  { %v123_v8 = vadd.f32 %v137_v6, %v100_v7 }
  0xd3   :  { %v153_v9 = vpop.f32.mrf.mxu0 }
  0xd4   :  { %125 = vst [vmem:[%s211_s3] sm:$0xff] %v123_v8 }
  0xd5   :  { %v103_v10 = vpop.f32.mrf.mxu0 }
  0xd6   :  { %v124_v11 = vadd.f32 %v137_v6, %v103_v10 }
  0xd7   :  { %v154_v12 = vpop.f32.mrf.mxu0 }
  0xd8   :  { %126 = vst [vmem:[%s211_s3 + $0x8] sm:$0xff] %v124_v11 }

</bundles_post_ra>
